<compile_context>
chip_gen: v7x
topology: tpu7x:2x2x1
jax: 0.10.0
libtpu: 0.0.40
codegen_flags: <defaults>
</compile_context>

<pallas_src>
import functools

import jax
import jax.numpy as jnp
from jax import lax
from jax.experimental import pallas as pl
from jax.experimental.pallas import tpu as pltpu

LRELU_SLOPE = 0.2
MID_CH = 16  # hidden channel count hard-coded in PoseEncoder.__init__


def _lrelu(x):
    return jnp.where(x >= 0, x, LRELU_SLOPE * x)


def _eff_weight(w, g):
    # Conv2dWN / Conv2dWNUB weight normalization: w * g / ||w||_F (scalar Frobenius norm)
    return w * (g / jnp.sqrt(jnp.sum(w * w)))[:, None, None, None]


# ----------------------------------------------------------------------------------
# Pallas kernel.  All activations are [C, bt*N] tiles (channels on sublanes, pixels of
# bt lane-batched images on lanes).  Weights / biases / mask are VMEM-resident.
# ----------------------------------------------------------------------------------
def _pose_encoder_kernel(S, bt,
                         lp_ref, wb1_ref, br1_ref, b11_ref, w12_ref, b12_ref,
                         w21_ref, b21_ref, w22_ref, b22_ref, wr2_ref, br2_ref,
                         mask_ref, out_ref):
    N = S * S
    NT = bt * N
    P = b11_ref.shape[0]
    # static per-tap pixel offsets of the 3x3 / padding=1 convolutions (tap-major)
    shifts = [(i - 1) * S + (j - 1) for i in range(3) for j in range(3)]

    mask9 = mask_ref[...]                                  # [9, NT] 0/1 boundary mask
    lp = lp_ref[...]                                       # [P, NT] tiled local pose

    def im2col9(x):
        # [C, NT] -> [9*C, NT] bf16: 9 lane-rolled (XLU) copies, each masked per tap
        # before the concat (single materialization).  pltpu.roll == jnp.roll, so a
        # roll by (-s) % NT reads pixel p+s; cross-image / array wraps are masked.
        parts = []
        for t, s in enumerate(shifts):
            if s == 0:
                part = x                                   # center tap: all valid
            else:
                part = pltpu.roll(x, (-s) % NT, axis=1) * mask9[t:t + 1, :]
            parts.append(part.astype(jnp.bfloat16))
        return jnp.concatenate(parts, axis=0)              # [9*C, NT]

    # ---- block 1: ConvBlock(P -> 16, kernel_size=1, padding=0) ----
    # tile2d input is spatially constant per image; w11 and the 1x1 skip conv are
    # stacked into a single tiny dot on the lane-batched tile.
    t1 = jnp.dot(wb1_ref[...], lp, preferred_element_type=jnp.float32)   # [P+C, NT]
    h0 = t1[:P, :]                                          # conv1 pre-bias
    sk1 = t1[P:, :] + br1_ref[...]                          # conv_resize skip + bias
    h = _lrelu(h0 + b11_ref[...])                           # + untied bias, lrelu
    h = _lrelu(jnp.dot(w12_ref[...], h,
                       preferred_element_type=jnp.float32) + b12_ref[...])
    x1 = h + sk1                                            # [C, NT] block-1 output

    # ---- block 2: ConvBlock(16 -> E, kernel_size=3, padding=1) ----
    h2 = _lrelu(jnp.dot(w21_ref[...], im2col9(x1),
                        preferred_element_type=jnp.float32) + b21_ref[...])
    main = _lrelu(jnp.dot(w22_ref[...], im2col9(h2),
                          preferred_element_type=jnp.float32) + b22_ref[...])
    # 1x1 residual skip is added AFTER the lrelu (this was the previous bug).
    skip2 = jnp.dot(wr2_ref[...], x1,
                    preferred_element_type=jnp.float32) + br2_ref[...]
    out = main + skip2                                      # [E, NT]

    # de-interleave the lane-batched images into the [bt, E, N] output block
    for b in range(bt):
        out_ref[b] = out[:, b * N:(b + 1) * N].astype(out_ref.dtype)


# ----------------------------------------------------------------------------------
# Wrapper: parameter layout conversion, lane-batching, pallas_call.
# ----------------------------------------------------------------------------------
def pose_encoder_forward(pose, params, *, n_pose_dims, n_embs, in_size,
                         num_steps=None):
    B = pose.shape[0]
    P, C, E, S = n_pose_dims, MID_CH, n_embs, in_size
    N = S * S

    p = params
    # ---- effective (weight-normalized) weights, in [Cout, Cin] layout ----
    wr1 = _eff_weight(p["b1_wr"], p["b1_gr"]).reshape(C, P)
    br1 = p["b1_br"]
    w11 = _eff_weight(p["b1_w1"], p["b1_g1"]).reshape(P, P)
    w12 = _eff_weight(p["b1_w2"], p["b1_g2"]).reshape(C, P)
    b11 = p["b1_ub1"].reshape(P, N)
    b12 = p["b1_ub2"].reshape(C, N)

    wr2 = _eff_weight(p["b2_wr"], p["b2_gr"]).reshape(E, C)
    br2 = p["b2_br"]
    # 3x3 weights -> [Cout, 9*Cin], tap-major (t = i*3 + j) to match the im2col rows
    w21 = _eff_weight(p["b2_w1"], p["b2_g1"]).transpose(0, 2, 3, 1).reshape(C, 9 * C)
    w22 = _eff_weight(p["b2_w2"], p["b2_g2"]).transpose(0, 2, 3, 1).reshape(E, 9 * C)
    b21 = p["b2_ub1"].reshape(C, N)
    b22 = p["b2_ub2"].reshape(E, N)

    # ---- grid sizing: 1 step on 1-TC chips (v5e/v6e), 2 parallel steps on v7x ----
    if num_steps is None:
        try:
            kind = jax.devices()[0].device_kind.lower()
        except Exception:
            kind = ""
        num_steps = 2 if ("v7" in kind or "7x" in kind) else 1
    num_steps = max(1, min(num_steps, B))
    bt = -(-B // num_steps)                 # images per grid step (lane-batched)
    b_pad = num_steps * bt
    NT = bt * N

    # ---- lane-batched, spatially tiled local pose: [P, b_pad*N] (zero padding) ----
    lp = pose[:, 6:].astype(jnp.float32)                    # [B, P]
    if b_pad != B:
        lp = jnp.pad(lp, ((0, b_pad - B), (0, 0)))          # zeros -> no NaNs downstream
    lp_wide = jnp.broadcast_to(lp.T[:, :, None], (P, b_pad, N)).reshape(P, b_pad * N)

    # ---- per-image biases / mask tiled across the bt lane-batched images ----
    tile_l = lambda a: jnp.tile(a, (1, bt))
    b11w, b12w, b21w, b22w = map(tile_l, (b11, b12, b21, b22))

    r = jnp.arange(N)
    yy, xx = r // S, r % S
    rows = []
    for i in range(3):
        for j in range(3):
            oy, ox = i - 1, j - 1
            rows.append(((yy + oy >= 0) & (yy + oy < S) &
                         (xx + ox >= 0) & (xx + ox < S)).astype(jnp.float32))
    mask9 = tile_l(jnp.stack(rows, axis=0))                 # [9, bt*N]

    wb1 = jnp.concatenate([w11, wr1], axis=0)               # [P+C, P]: conv1 + skip stacked

    weights = [wb1, br1[:, None], b11w, w12, b12w,
               w21.astype(jnp.bfloat16), b21w,
               w22.astype(jnp.bfloat16), b22w,
               wr2, br2[:, None], mask9]

    def const_spec(a):
        return pl.BlockSpec(a.shape, lambda g: (0, 0))      # all constants are 2-D

    out = pl.pallas_call(
        functools.partial(_pose_encoder_kernel, S, bt),
        out_shape=jax.ShapeDtypeStruct((b_pad, E, N), jnp.float32),
        grid_spec=pltpu.PrefetchScalarGridSpec(
            num_scalar_prefetch=0,
            grid=(num_steps,),
            in_specs=[pl.BlockSpec((P, NT), lambda g: (0, g))]
                     + [const_spec(a) for a in weights],
            out_specs=pl.BlockSpec((bt, E, N), lambda g: (g, 0, 0)),
        ),
        compiler_params=pltpu.CompilerParams(dimension_semantics=("parallel",)),
    )(lp_wide, *weights)

    # lane-dense [B, E, N] output -> NCHW [B, E, S, S]: a pure reshape, no transpose.
    return out[:B].reshape(B, E, S, S)


# ----------------------------------------------------------------------------------
# Deterministic synthetic parameters (PyTorch shapes: OIHW weights, per-channel g,
# channel bias for Conv2dWN, untied (C,H,W) bias for Conv2dWNUB).
# ----------------------------------------------------------------------------------
def init_params(key, n_pose_dims, n_embs, in_size):
    P, C, E, S = n_pose_dims, MID_CH, n_embs, in_size
    ks = jax.random.split(key, 18)
    nrm = lambda k, shape, s=0.1: s * jax.random.normal(k, shape, jnp.float32)
    return dict(
        # block 1: ConvBlock(P, 16, S, kernel_size=1, padding=0)
        b1_wr=nrm(ks[0], (C, P, 1, 1)), b1_gr=1.0 + nrm(ks[1], (C,)), b1_br=nrm(ks[2], (C,)),
        b1_w1=nrm(ks[3], (P, P, 1, 1)), b1_g1=1.0 + nrm(ks[4], (P,)), b1_ub1=nrm(ks[5], (P, S, S)),
        b1_w2=nrm(ks[6], (C, P, 1, 1)), b1_g2=1.0 + nrm(ks[7], (C,)), b1_ub2=nrm(ks[8], (C, S, S)),
        # block 2: ConvBlock(16, E, S, kernel_size=3, padding=1)
        b2_wr=nrm(ks[9], (E, C, 1, 1)), b2_gr=1.0 + nrm(ks[10], (E,)), b2_br=nrm(ks[11], (E,)),
        b2_w1=nrm(ks[12], (C, C, 3, 3)), b2_g1=1.0 + nrm(ks[13], (C,)), b2_ub1=nrm(ks[14], (C, S, S)),
        b2_w2=nrm(ks[15], (E, C, 3, 3)), b2_g2=1.0 + nrm(ks[16], (E,)), b2_ub2=nrm(ks[17], (E, S, S)),
    )


# ----------------------------------------------------------------------------------
# Pure-JAX (NCHW, lax.conv) reference that mirrors the PyTorch module exactly.
# ----------------------------------------------------------------------------------
def _ref_forward(pose, params, *, n_pose_dims, n_embs, in_size):
    B = pose.shape[0]
    P, S = n_pose_dims, in_size
    local = pose[:, 6:]
    x = jnp.broadcast_to(local[:, :, None, None], (B, P, S, S))   # tile2d

    def conv(x, w, pad):
        return lax.conv_general_dilated(
            x, w, window_strides=(1, 1),
            padding=((pad, pad), (pad, pad)),
            dimension_numbers=("NCHW", "OIHW", "NCHW"))

    def conv_block(x, wr, gr, br, w1, g1, ub1, w2, g2, ub2, pad):
        skip = conv(x, _eff_weight(wr, gr), 0) + br[None, :, None, None]
        h = _lrelu(conv(x, _eff_weight(w1, g1), pad) + ub1[None])
        h = _lrelu(conv(h, _eff_weight(w2, g2), pad) + ub2[None])
        return h + skip

    p = params
    x = conv_block(x, p["b1_wr"], p["b1_gr"], p["b1_br"],
                   p["b1_w1"], p["b1_g1"], p["b1_ub1"],
                   p["b1_w2"], p["b1_g2"], p["b1_ub2"], pad=0)
    x = conv_block(x, p["b2_wr"], p["b2_gr"], p["b2_br"],
                   p["b2_w1"], p["b2_g1"], p["b2_ub1"],
                   p["b2_w2"], p["b2_g2"], p["b2_ub2"], pad=1)
    return x


if __name__ == "__main__":
    B, n_pose_dims, n_embs, in_size = 2, 16, 32, 16

    key = jax.random.PRNGKey(0)
    k_pose, k_par = jax.random.split(key)
    pose = jax.random.normal(k_pose, (B, 6 + n_pose_dims), jnp.float32)
    params = init_params(k_par, n_pose_dims, n_embs, in_size)

    fwd = jax.jit(functools.partial(pose_encoder_forward, n_pose_dims=n_pose_dims,
                                    n_embs=n_embs, in_size=in_size))
    out = jax.block_until_ready(fwd(pose, params))

    ref = _ref_forward(pose, params, n_pose_dims=n_pose_dims,
                       n_embs=n_embs, in_size=in_size)
    assert out.shape == (B, n_embs, in_size, in_size), out.shape
    err = float(jnp.max(jnp.abs(out - ref)))
    scale = float(jnp.max(jnp.abs(ref))) + 1e-6
    # 2e-2 relative: layout/shift/mask/activation bugs show up as O(0.1-1) relative
    # error (the previous skip-fusion bug was 0.57); this tolerance only needs to
    # absorb bf16 matmul-operand rounding in the kernel plus default MXU precision
    # in the lax.conv reference path.
    assert err / scale < 2e-2, f"mismatch: max abs err {err} vs scale {scale}"

    print("KERNEL_OK")
</pallas_src>

<mosaic_0001>
module attributes {stable_mosaic.version = 11 : i64} {
  func.func @_pose_encoder_kernel(%arg0: i32, %arg1: memref<16x512xf32, #tpu.memory_space<vmem>>, %arg2: memref<32x16xf32, #tpu.memory_space<vmem>>, %arg3: memref<16x1xf32, #tpu.memory_space<vmem>>, %arg4: memref<16x512xf32, #tpu.memory_space<vmem>>, %arg5: memref<16x16xf32, #tpu.memory_space<vmem>>, %arg6: memref<16x512xf32, #tpu.memory_space<vmem>>, %arg7: memref<16x144xbf16, #tpu.memory_space<vmem>>, %arg8: memref<16x512xf32, #tpu.memory_space<vmem>>, %arg9: memref<32x144xbf16, #tpu.memory_space<vmem>>, %arg10: memref<32x512xf32, #tpu.memory_space<vmem>>, %arg11: memref<32x16xf32, #tpu.memory_space<vmem>>, %arg12: memref<32x1xf32, #tpu.memory_space<vmem>>, %arg13: memref<9x512xf32, #tpu.memory_space<vmem>>, %arg14: memref<2x32x256xf32, #tpu.memory_space<vmem>>) attributes {dimension_semantics = [#tpu.dimension_semantics<parallel>], iteration_bounds = array<i64: 1>, scalar_prefetch = 0 : i64, scratch_operands = 0 : i64, tpu.core_type = #tpu.core_type<tc>, window_params = [{transform_indices = @transform_0, window_bounds = array<i64: 16, 512>}, {pipeline_mode = #tpu.pipeline_mode<synchronous>, transform_indices = @transform_1, window_bounds = array<i64: 32, 16>}, {pipeline_mode = #tpu.pipeline_mode<synchronous>, transform_indices = @transform_2, window_bounds = array<i64: 16, 1>}, {pipeline_mode = #tpu.pipeline_mode<synchronous>, transform_indices = @transform_3, window_bounds = array<i64: 16, 512>}, {pipeline_mode = #tpu.pipeline_mode<synchronous>, transform_indices = @transform_4, window_bounds = array<i64: 16, 16>}, {pipeline_mode = #tpu.pipeline_mode<synchronous>, transform_indices = @transform_5, window_bounds = array<i64: 16, 512>}, {pipeline_mode = #tpu.pipeline_mode<synchronous>, transform_indices = @transform_6, window_bounds = array<i64: 16, 144>}, {pipeline_mode = #tpu.pipeline_mode<synchronous>, transform_indices = @transform_7, window_bounds = array<i64: 16, 512>}, {pipeline_mode = #tpu.pipeline_mode<synchronous>, transform_indices = @transform_8, window_bounds = array<i64: 32, 144>}, {pipeline_mode = #tpu.pipeline_mode<synchronous>, transform_indices = @transform_9, window_bounds = array<i64: 32, 512>}, {pipeline_mode = #tpu.pipeline_mode<synchronous>, transform_indices = @transform_10, window_bounds = array<i64: 32, 16>}, {pipeline_mode = #tpu.pipeline_mode<synchronous>, transform_indices = @transform_11, window_bounds = array<i64: 32, 1>}, {pipeline_mode = #tpu.pipeline_mode<synchronous>, transform_indices = @transform_12, window_bounds = array<i64: 9, 512>}, {transform_indices = @transform_13, window_bounds = array<i64: 2, 32, 256>}]} {
    %c0 = arith.constant 0 : index
    %c0_0 = arith.constant 0 : index
    %0 = vector.load %arg13[%c0, %c0_0] : memref<9x512xf32, #tpu.memory_space<vmem>>, vector<9x512xf32>
    %c0_1 = arith.constant 0 : index
    %c0_2 = arith.constant 0 : index
    %1 = vector.load %arg1[%c0_1, %c0_2] : memref<16x512xf32, #tpu.memory_space<vmem>>, vector<16x512xf32>
    %c0_3 = arith.constant 0 : index
    %c0_4 = arith.constant 0 : index
    %2 = vector.load %arg2[%c0_3, %c0_4] : memref<32x16xf32, #tpu.memory_space<vmem>>, vector<32x16xf32>
    %cst = arith.constant dense<0.000000e+00> : vector<32x512xf32>
    %3 = tpu.matmul %2, %1, %cst {dimension_numbers = #tpu.dot_dimension_numbers<[1], [0], [0], [1], [0, 0, 1, 1], [], []>} : vector<32x16xf32>, vector<16x512xf32>, vector<32x512xf32> -> vector<32x512xf32>
    %4 = vector.extract_strided_slice %3 {offsets = [0, 0], sizes = [16, 512], strides = [1, 1]} : vector<32x512xf32> to vector<16x512xf32>
    %5 = vector.extract_strided_slice %3 {offsets = [16, 0], sizes = [16, 512], strides = [1, 1]} : vector<32x512xf32> to vector<16x512xf32>
    %c0_5 = arith.constant 0 : index
    %c0_6 = arith.constant 0 : index
    %6 = vector.load %arg3[%c0_5, %c0_6] : memref<16x1xf32, #tpu.memory_space<vmem>>, vector<16x1xf32>
    %7 = vector.broadcast %6 : vector<16x1xf32> to vector<16x512xf32>
    %8 = arith.addf %5, %7 : vector<16x512xf32>
    %c0_7 = arith.constant 0 : index
    %c0_8 = arith.constant 0 : index
    %9 = vector.load %arg4[%c0_7, %c0_8] : memref<16x512xf32, #tpu.memory_space<vmem>>, vector<16x512xf32>
    %10 = arith.addf %4, %9 : vector<16x512xf32>
    %cst_9 = arith.constant 0.000000e+00 : f32
    %11 = vector.broadcast %cst_9 : f32 to vector<16x512xf32>
    %12 = arith.cmpf oge, %10, %11 : vector<16x512xf32>
    %cst_10 = arith.constant 2.000000e-01 : f32
    %13 = vector.broadcast %cst_10 : f32 to vector<16x512xf32>
    %14 = arith.mulf %13, %10 : vector<16x512xf32>
    %15 = arith.select %12, %10, %14 : vector<16x512xi1>, vector<16x512xf32>
    %c0_11 = arith.constant 0 : index
    %c0_12 = arith.constant 0 : index
    %16 = vector.load %arg5[%c0_11, %c0_12] : memref<16x16xf32, #tpu.memory_space<vmem>>, vector<16x16xf32>
    %cst_13 = arith.constant dense<0.000000e+00> : vector<16x512xf32>
    %17 = tpu.matmul %16, %15, %cst_13 {dimension_numbers = #tpu.dot_dimension_numbers<[1], [0], [0], [1], [0, 0, 1, 1], [], []>} : vector<16x16xf32>, vector<16x512xf32>, vector<16x512xf32> -> vector<16x512xf32>
    %c0_14 = arith.constant 0 : index
    %c0_15 = arith.constant 0 : index
    %18 = vector.load %arg6[%c0_14, %c0_15] : memref<16x512xf32, #tpu.memory_space<vmem>>, vector<16x512xf32>
    %19 = arith.addf %17, %18 : vector<16x512xf32>
    %cst_16 = arith.constant 0.000000e+00 : f32
    %20 = vector.broadcast %cst_16 : f32 to vector<16x512xf32>
    %21 = arith.cmpf oge, %19, %20 : vector<16x512xf32>
    %cst_17 = arith.constant 2.000000e-01 : f32
    %22 = vector.broadcast %cst_17 : f32 to vector<16x512xf32>
    %23 = arith.mulf %22, %19 : vector<16x512xf32>
    %24 = arith.select %21, %19, %23 : vector<16x512xi1>, vector<16x512xf32>
    %25 = arith.addf %24, %8 : vector<16x512xf32>
    %c0_18 = arith.constant 0 : index
    %c0_19 = arith.constant 0 : index
    %26 = vector.load %arg7[%c0_18, %c0_19] : memref<16x144xbf16, #tpu.memory_space<vmem>>, vector<16x144xbf16>
    %c17_i32 = arith.constant 17 : i32
    %27 = tpu.dynamic_rotate %25 by %c17_i32 dim 1 : vector<16x512xf32>, i32 -> vector<16x512xf32>
    %28 = vector.extract_strided_slice %0 {offsets = [0, 0], sizes = [1, 512], strides = [1, 1]} : vector<9x512xf32> to vector<1x512xf32>
    %29 = vector.broadcast %28 : vector<1x512xf32> to vector<16x512xf32>
    %30 = arith.mulf %27, %29 : vector<16x512xf32>
    %31 = arith.truncf %30 : vector<16x512xf32> to vector<16x512xbf16>
    %c16_i32 = arith.constant 16 : i32
    %32 = tpu.dynamic_rotate %25 by %c16_i32 dim 1 : vector<16x512xf32>, i32 -> vector<16x512xf32>
    %33 = vector.extract_strided_slice %0 {offsets = [1, 0], sizes = [1, 512], strides = [1, 1]} : vector<9x512xf32> to vector<1x512xf32>
    %34 = vector.broadcast %33 : vector<1x512xf32> to vector<16x512xf32>
    %35 = arith.mulf %32, %34 : vector<16x512xf32>
    %36 = arith.truncf %35 : vector<16x512xf32> to vector<16x512xbf16>
    %c15_i32 = arith.constant 15 : i32
    %37 = tpu.dynamic_rotate %25 by %c15_i32 dim 1 : vector<16x512xf32>, i32 -> vector<16x512xf32>
    %38 = vector.extract_strided_slice %0 {offsets = [2, 0], sizes = [1, 512], strides = [1, 1]} : vector<9x512xf32> to vector<1x512xf32>
    %39 = vector.broadcast %38 : vector<1x512xf32> to vector<16x512xf32>
    %40 = arith.mulf %37, %39 : vector<16x512xf32>
    %41 = arith.truncf %40 : vector<16x512xf32> to vector<16x512xbf16>
    %c1_i32 = arith.constant 1 : i32
    %42 = tpu.dynamic_rotate %25 by %c1_i32 dim 1 : vector<16x512xf32>, i32 -> vector<16x512xf32>
    %43 = vector.extract_strided_slice %0 {offsets = [3, 0], sizes = [1, 512], strides = [1, 1]} : vector<9x512xf32> to vector<1x512xf32>
    %44 = vector.broadcast %43 : vector<1x512xf32> to vector<16x512xf32>
    %45 = arith.mulf %42, %44 : vector<16x512xf32>
    %46 = arith.truncf %45 : vector<16x512xf32> to vector<16x512xbf16>
    %47 = arith.truncf %25 : vector<16x512xf32> to vector<16x512xbf16>
    %c511_i32 = arith.constant 511 : i32
    %48 = tpu.dynamic_rotate %25 by %c511_i32 dim 1 : vector<16x512xf32>, i32 -> vector<16x512xf32>
    %49 = vector.extract_strided_slice %0 {offsets = [5, 0], sizes = [1, 512], strides = [1, 1]} : vector<9x512xf32> to vector<1x512xf32>
    %50 = vector.broadcast %49 : vector<1x512xf32> to vector<16x512xf32>
    %51 = arith.mulf %48, %50 : vector<16x512xf32>
    %52 = arith.truncf %51 : vector<16x512xf32> to vector<16x512xbf16>
    %c497_i32 = arith.constant 497 : i32
    %53 = tpu.dynamic_rotate %25 by %c497_i32 dim 1 : vector<16x512xf32>, i32 -> vector<16x512xf32>
    %54 = vector.extract_strided_slice %0 {offsets = [6, 0], sizes = [1, 512], strides = [1, 1]} : vector<9x512xf32> to vector<1x512xf32>
    %55 = vector.broadcast %54 : vector<1x512xf32> to vector<16x512xf32>
    %56 = arith.mulf %53, %55 : vector<16x512xf32>
    %57 = arith.truncf %56 : vector<16x512xf32> to vector<16x512xbf16>
    %c496_i32 = arith.constant 496 : i32
    %58 = tpu.dynamic_rotate %25 by %c496_i32 dim 1 : vector<16x512xf32>, i32 -> vector<16x512xf32>
    %59 = vector.extract_strided_slice %0 {offsets = [7, 0], sizes = [1, 512], strides = [1, 1]} : vector<9x512xf32> to vector<1x512xf32>
    %60 = vector.broadcast %59 : vector<1x512xf32> to vector<16x512xf32>
    %61 = arith.mulf %58, %60 : vector<16x512xf32>
    %62 = arith.truncf %61 : vector<16x512xf32> to vector<16x512xbf16>
    %c495_i32 = arith.constant 495 : i32
    %63 = tpu.dynamic_rotate %25 by %c495_i32 dim 1 : vector<16x512xf32>, i32 -> vector<16x512xf32>
    %64 = vector.extract_strided_slice %0 {offsets = [8, 0], sizes = [1, 512], strides = [1, 1]} : vector<9x512xf32> to vector<1x512xf32>
    %65 = vector.broadcast %64 : vector<1x512xf32> to vector<16x512xf32>
    %66 = arith.mulf %63, %65 : vector<16x512xf32>
    %67 = arith.truncf %66 : vector<16x512xf32> to vector<16x512xbf16>
    %68 = tpu.concatenate %31, %36, %41, %46, %47, %52, %57, %62, %67 in 0 : vector<16x512xbf16>, vector<16x512xbf16>, vector<16x512xbf16>, vector<16x512xbf16>, vector<16x512xbf16>, vector<16x512xbf16>, vector<16x512xbf16>, vector<16x512xbf16>, vector<16x512xbf16> -> vector<144x512xbf16>
    %cst_20 = arith.constant dense<0.000000e+00> : vector<16x512xf32>
    %69 = tpu.matmul %26, %68, %cst_20 {dimension_numbers = #tpu.dot_dimension_numbers<[1], [0], [0], [1], [0, 0, 1, 1], [], []>} : vector<16x144xbf16>, vector<144x512xbf16>, vector<16x512xf32> -> vector<16x512xf32>
    %c0_21 = arith.constant 0 : index
    %c0_22 = arith.constant 0 : index
    %70 = vector.load %arg8[%c0_21, %c0_22] : memref<16x512xf32, #tpu.memory_space<vmem>>, vector<16x512xf32>
    %71 = arith.addf %69, %70 : vector<16x512xf32>
    %cst_23 = arith.constant 0.000000e+00 : f32
    %72 = vector.broadcast %cst_23 : f32 to vector<16x512xf32>
    %73 = arith.cmpf oge, %71, %72 : vector<16x512xf32>
    %cst_24 = arith.constant 2.000000e-01 : f32
    %74 = vector.broadcast %cst_24 : f32 to vector<16x512xf32>
    %75 = arith.mulf %74, %71 : vector<16x512xf32>
    %76 = arith.select %73, %71, %75 : vector<16x512xi1>, vector<16x512xf32>
    %c0_25 = arith.constant 0 : index
    %c0_26 = arith.constant 0 : index
    %77 = vector.load %arg9[%c0_25, %c0_26] : memref<32x144xbf16, #tpu.memory_space<vmem>>, vector<32x144xbf16>
    %c17_i32_27 = arith.constant 17 : i32
    %78 = tpu.dynamic_rotate %76 by %c17_i32_27 dim 1 : vector<16x512xf32>, i32 -> vector<16x512xf32>
    %79 = vector.extract_strided_slice %0 {offsets = [0, 0], sizes = [1, 512], strides = [1, 1]} : vector<9x512xf32> to vector<1x512xf32>
    %80 = vector.broadcast %79 : vector<1x512xf32> to vector<16x512xf32>
    %81 = arith.mulf %78, %80 : vector<16x512xf32>
    %82 = arith.truncf %81 : vector<16x512xf32> to vector<16x512xbf16>
    %c16_i32_28 = arith.constant 16 : i32
    %83 = tpu.dynamic_rotate %76 by %c16_i32_28 dim 1 : vector<16x512xf32>, i32 -> vector<16x512xf32>
    %84 = vector.extract_strided_slice %0 {offsets = [1, 0], sizes = [1, 512], strides = [1, 1]} : vector<9x512xf32> to vector<1x512xf32>
    %85 = vector.broadcast %84 : vector<1x512xf32> to vector<16x512xf32>
    %86 = arith.mulf %83, %85 : vector<16x512xf32>
    %87 = arith.truncf %86 : vector<16x512xf32> to vector<16x512xbf16>
    %c15_i32_29 = arith.constant 15 : i32
    %88 = tpu.dynamic_rotate %76 by %c15_i32_29 dim 1 : vector<16x512xf32>, i32 -> vector<16x512xf32>
    %89 = vector.extract_strided_slice %0 {offsets = [2, 0], sizes = [1, 512], strides = [1, 1]} : vector<9x512xf32> to vector<1x512xf32>
    %90 = vector.broadcast %89 : vector<1x512xf32> to vector<16x512xf32>
    %91 = arith.mulf %88, %90 : vector<16x512xf32>
    %92 = arith.truncf %91 : vector<16x512xf32> to vector<16x512xbf16>
    %c1_i32_30 = arith.constant 1 : i32
    %93 = tpu.dynamic_rotate %76 by %c1_i32_30 dim 1 : vector<16x512xf32>, i32 -> vector<16x512xf32>
    %94 = vector.extract_strided_slice %0 {offsets = [3, 0], sizes = [1, 512], strides = [1, 1]} : vector<9x512xf32> to vector<1x512xf32>
    %95 = vector.broadcast %94 : vector<1x512xf32> to vector<16x512xf32>
    %96 = arith.mulf %93, %95 : vector<16x512xf32>
    %97 = arith.truncf %96 : vector<16x512xf32> to vector<16x512xbf16>
    %98 = arith.truncf %76 : vector<16x512xf32> to vector<16x512xbf16>
    %c511_i32_31 = arith.constant 511 : i32
    %99 = tpu.dynamic_rotate %76 by %c511_i32_31 dim 1 : vector<16x512xf32>, i32 -> vector<16x512xf32>
    %100 = vector.extract_strided_slice %0 {offsets = [5, 0], sizes = [1, 512], strides = [1, 1]} : vector<9x512xf32> to vector<1x512xf32>
    %101 = vector.broadcast %100 : vector<1x512xf32> to vector<16x512xf32>
    %102 = arith.mulf %99, %101 : vector<16x512xf32>
    %103 = arith.truncf %102 : vector<16x512xf32> to vector<16x512xbf16>
    %c497_i32_32 = arith.constant 497 : i32
    %104 = tpu.dynamic_rotate %76 by %c497_i32_32 dim 1 : vector<16x512xf32>, i32 -> vector<16x512xf32>
    %105 = vector.extract_strided_slice %0 {offsets = [6, 0], sizes = [1, 512], strides = [1, 1]} : vector<9x512xf32> to vector<1x512xf32>
    %106 = vector.broadcast %105 : vector<1x512xf32> to vector<16x512xf32>
    %107 = arith.mulf %104, %106 : vector<16x512xf32>
    %108 = arith.truncf %107 : vector<16x512xf32> to vector<16x512xbf16>
    %c496_i32_33 = arith.constant 496 : i32
    %109 = tpu.dynamic_rotate %76 by %c496_i32_33 dim 1 : vector<16x512xf32>, i32 -> vector<16x512xf32>
    %110 = vector.extract_strided_slice %0 {offsets = [7, 0], sizes = [1, 512], strides = [1, 1]} : vector<9x512xf32> to vector<1x512xf32>
    %111 = vector.broadcast %110 : vector<1x512xf32> to vector<16x512xf32>
    %112 = arith.mulf %109, %111 : vector<16x512xf32>
    %113 = arith.truncf %112 : vector<16x512xf32> to vector<16x512xbf16>
    %c495_i32_34 = arith.constant 495 : i32
    %114 = tpu.dynamic_rotate %76 by %c495_i32_34 dim 1 : vector<16x512xf32>, i32 -> vector<16x512xf32>
    %115 = vector.extract_strided_slice %0 {offsets = [8, 0], sizes = [1, 512], strides = [1, 1]} : vector<9x512xf32> to vector<1x512xf32>
    %116 = vector.broadcast %115 : vector<1x512xf32> to vector<16x512xf32>
    %117 = arith.mulf %114, %116 : vector<16x512xf32>
    %118 = arith.truncf %117 : vector<16x512xf32> to vector<16x512xbf16>
    %119 = tpu.concatenate %82, %87, %92, %97, %98, %103, %108, %113, %118 in 0 : vector<16x512xbf16>, vector<16x512xbf16>, vector<16x512xbf16>, vector<16x512xbf16>, vector<16x512xbf16>, vector<16x512xbf16>, vector<16x512xbf16>, vector<16x512xbf16>, vector<16x512xbf16> -> vector<144x512xbf16>
    %cst_35 = arith.constant dense<0.000000e+00> : vector<32x512xf32>
    %120 = tpu.matmul %77, %119, %cst_35 {dimension_numbers = #tpu.dot_dimension_numbers<[1], [0], [0], [1], [0, 0, 1, 1], [], []>} : vector<32x144xbf16>, vector<144x512xbf16>, vector<32x512xf32> -> vector<32x512xf32>
    %c0_36 = arith.constant 0 : index
    %c0_37 = arith.constant 0 : index
    %121 = vector.load %arg10[%c0_36, %c0_37] : memref<32x512xf32, #tpu.memory_space<vmem>>, vector<32x512xf32>
    %122 = arith.addf %120, %121 : vector<32x512xf32>
    %cst_38 = arith.constant 0.000000e+00 : f32
    %123 = vector.broadcast %cst_38 : f32 to vector<32x512xf32>
    %124 = arith.cmpf oge, %122, %123 : vector<32x512xf32>
    %cst_39 = arith.constant 2.000000e-01 : f32
    %125 = vector.broadcast %cst_39 : f32 to vector<32x512xf32>
    %126 = arith.mulf %125, %122 : vector<32x512xf32>
    %127 = arith.select %124, %122, %126 : vector<32x512xi1>, vector<32x512xf32>
    %c0_40 = arith.constant 0 : index
    %c0_41 = arith.constant 0 : index
    %128 = vector.load %arg11[%c0_40, %c0_41] : memref<32x16xf32, #tpu.memory_space<vmem>>, vector<32x16xf32>
    %cst_42 = arith.constant dense<0.000000e+00> : vector<32x512xf32>
    %129 = tpu.matmul %128, %25, %cst_42 {dimension_numbers = #tpu.dot_dimension_numbers<[1], [0], [0], [1], [0, 0, 1, 1], [], []>} : vector<32x16xf32>, vector<16x512xf32>, vector<32x512xf32> -> vector<32x512xf32>
    %c0_43 = arith.constant 0 : index
    %c0_44 = arith.constant 0 : index
    %130 = vector.load %arg12[%c0_43, %c0_44] : memref<32x1xf32, #tpu.memory_space<vmem>>, vector<32x1xf32>
    %131 = vector.broadcast %130 : vector<32x1xf32> to vector<32x512xf32>
    %132 = arith.addf %129, %131 : vector<32x512xf32>
    %133 = arith.addf %127, %132 : vector<32x512xf32>
    %134 = vector.extract_strided_slice %133 {offsets = [0, 0], sizes = [32, 256], strides = [1, 1]} : vector<32x512xf32> to vector<32x256xf32>
    %c0_45 = arith.constant 0 : index
    %c0_46 = arith.constant 0 : index
    %c0_47 = arith.constant 0 : index
    %135 = vector.load %arg14[%c0_45, %c0_46, %c0_47] : memref<2x32x256xf32, #tpu.memory_space<vmem>>, vector<1x32x256xf32>
    %136 = vector.shape_cast %135 : vector<1x32x256xf32> to vector<32x256xf32>
    %137 = vector.shape_cast %134 : vector<32x256xf32> to vector<1x32x256xf32>
    tpu.vector_store %arg14[%c0_45, %c0_46, %c0_47], %137 {strides = array<i32>} : memref<2x32x256xf32, #tpu.memory_space<vmem>>, vector<1x32x256xf32>,
    %138 = vector.extract_strided_slice %133 {offsets = [0, 256], sizes = [32, 256], strides = [1, 1]} : vector<32x512xf32> to vector<32x256xf32>
    %c1 = arith.constant 1 : index
    %c0_48 = arith.constant 0 : index
    %c0_49 = arith.constant 0 : index
    %139 = vector.load %arg14[%c1, %c0_48, %c0_49] : memref<2x32x256xf32, #tpu.memory_space<vmem>>, vector<1x32x256xf32>
    %140 = vector.shape_cast %139 : vector<1x32x256xf32> to vector<32x256xf32>
    %141 = vector.shape_cast %138 : vector<32x256xf32> to vector<1x32x256xf32>
    tpu.vector_store %arg14[%c1, %c0_48, %c0_49], %141 {strides = array<i32>} : memref<2x32x256xf32, #tpu.memory_space<vmem>>, vector<1x32x256xf32>,
    return
  }
  func.func @transform_0(%arg0: i32) -> (i32, i32) {
    %c0_i32 = arith.constant 0 : i32
    %c0_i32_0 = arith.constant 0 : i32
    return %c0_i32, %arg0 : i32, i32
  }
  func.func @transform_1(%arg0: i32) -> (i32, i32) {
    %c0_i32 = arith.constant 0 : i32
    %c0_i32_0 = arith.constant 0 : i32
    %c0_i32_1 = arith.constant 0 : i32
    return %c0_i32, %c0_i32_0 : i32, i32
  }
  func.func @transform_2(%arg0: i32) -> (i32, i32) {
    %c0_i32 = arith.constant 0 : i32
    %c0_i32_0 = arith.constant 0 : i32
    %c0_i32_1 = arith.constant 0 : i32
    return %c0_i32, %c0_i32_0 : i32, i32
  }
  func.func @transform_3(%arg0: i32) -> (i32, i32) {
    %c0_i32 = arith.constant 0 : i32
    %c0_i32_0 = arith.constant 0 : i32
    %c0_i32_1 = arith.constant 0 : i32
    return %c0_i32, %c0_i32_0 : i32, i32
  }
  func.func @transform_4(%arg0: i32) -> (i32, i32) {
    %c0_i32 = arith.constant 0 : i32
    %c0_i32_0 = arith.constant 0 : i32
    %c0_i32_1 = arith.constant 0 : i32
    return %c0_i32, %c0_i32_0 : i32, i32
  }
  func.func @transform_5(%arg0: i32) -> (i32, i32) {
    %c0_i32 = arith.constant 0 : i32
    %c0_i32_0 = arith.constant 0 : i32
    %c0_i32_1 = arith.constant 0 : i32
    return %c0_i32, %c0_i32_0 : i32, i32
  }
  func.func @transform_6(%arg0: i32) -> (i32, i32) {
    %c0_i32 = arith.constant 0 : i32
    %c0_i32_0 = arith.constant 0 : i32
    %c0_i32_1 = arith.constant 0 : i32
    return %c0_i32, %c0_i32_0 : i32, i32
  }
  func.func @transform_7(%arg0: i32) -> (i32, i32) {
    %c0_i32 = arith.constant 0 : i32
    %c0_i32_0 = arith.constant 0 : i32
    %c0_i32_1 = arith.constant 0 : i32
    return %c0_i32, %c0_i32_0 : i32, i32
  }
  func.func @transform_8(%arg0: i32) -> (i32, i32) {
    %c0_i32 = arith.constant 0 : i32
    %c0_i32_0 = arith.constant 0 : i32
    %c0_i32_1 = arith.constant 0 : i32
    return %c0_i32, %c0_i32_0 : i32, i32
  }
  func.func @transform_9(%arg0: i32) -> (i32, i32) {
    %c0_i32 = arith.constant 0 : i32
    %c0_i32_0 = arith.constant 0 : i32
    %c0_i32_1 = arith.constant 0 : i32
    return %c0_i32, %c0_i32_0 : i32, i32
  }
  func.func @transform_10(%arg0: i32) -> (i32, i32) {
    %c0_i32 = arith.constant 0 : i32
    %c0_i32_0 = arith.constant 0 : i32
    %c0_i32_1 = arith.constant 0 : i32
    return %c0_i32, %c0_i32_0 : i32, i32
  }
  func.func @transform_11(%arg0: i32) -> (i32, i32) {
    %c0_i32 = arith.constant 0 : i32
    %c0_i32_0 = arith.constant 0 : i32
    %c0_i32_1 = arith.constant 0 : i32
    return %c0_i32, %c0_i32_0 : i32, i32
  }
  func.func @transform_12(%arg0: i32) -> (i32, i32) {
    %c0_i32 = arith.constant 0 : i32
    %c0_i32_0 = arith.constant 0 : i32
    %c0_i32_1 = arith.constant 0 : i32
    return %c0_i32, %c0_i32_0 : i32, i32
  }
  func.func @transform_13(%arg0: i32) -> (i32, i32, i32) {
    %c0_i32 = arith.constant 0 : i32
    %c0_i32_0 = arith.constant 0 : i32
    %c0_i32_1 = arith.constant 0 : i32
    return %arg0, %c0_i32, %c0_i32_0 : i32, i32, i32
  }
}

</mosaic_0001>

<bundles_post_ra>
// kernel: pose_encoder_forward.1
= control target key start
LH: loop header
LB: loop body
LE: loop exit
PB: predicated region body
PF: predicated region fallthrough
CT: control target
= control target key end

     0   :  { %v3422_v3 = vmov 0.0   ;;  %vm65_vm0 = vcmask 130048   ;;  %v1915_v17 = vmov 0   ;;  %s1916_s29 = smov 17   ;;  %s1918_s30 = smov 15   ;;  %s3408_s0 = inlined_call_operand.vmem [shape: f32[16,512], index: 0, kind: input, shape index: {}]   ;;  %s3409_s1 = inlined_call_operand.vmem [shape: f32[32,16], index: 1, kind: input, shape index: {}]   ;;  %s3410_s2 = inlined_call_operand.vmem [shape: f32[16,1], index: 2, kind: input, shape index: {}]   ;;  %s3411_s3 = inlined_call_operand.vmem [shape: f32[16,512], index: 3, kind: input, shape index: {}]   ;;  %s3412_s4 = inlined_call_operand.vmem [shape: f32[16,16], index: 4, kind: input, shape index: {}]   ;;  %s3413_s5 = inlined_call_operand.vmem [shape: f32[16,512], index: 5, kind: input, shape index: {}]   ;;  %s3414_s6 = inlined_call_operand.vmem [shape: bf16[16,144], index: 6, kind: input, shape index: {}]   ;;  %s3415_s12 = inlined_call_operand.vmem [shape: f32[9,512], index: 12, kind: input, shape index: {}]   ;;  %s3416_s7 = inlined_call_operand.vmem [shape: f32[16,512], index: 7, kind: input, shape index: {}]   ;;  %s3417_s8 = inlined_call_operand.vmem [shape: bf16[32,144], index: 8, kind: input, shape index: {}]   ;;  %s3418_s11 = inlined_call_operand.vmem [shape: f32[32,1], index: 11, kind: input, shape index: {}]   ;;  %s3419_s10 = inlined_call_operand.vmem [shape: f32[32,16], index: 10, kind: input, shape index: {}]   ;;  %s3420_s9 = inlined_call_operand.vmem [shape: f32[32,512], index: 9, kind: input, shape index: {}]   ;;  %s3421_s13 = inlined_call_operand.vmem [shape: f32[2,32,256], index: 13, kind: output, shape index: {}]  }
   0x1   :  { %v54_v0 = vld [vmem:[%s3408_s0 + $0x8] sm:$0xff]  ;;  %v56_v2 = vld [vmem:[%s3408_s0 + $0x18] sm:$0xff]  ;;  %142 = vmatprep.mubr.f32.mxu0 %v3422_v3  ;;  %231 = vmatprep.mubr.f32.mxu1 %v3422_v3  ;;  %v53_v6 = vld [vmem:[%s3408_s0] sm:$0xff]  ;;  %s1920_s14 = smov 127   ;;  %s1921_s15 = smov 113  }
   0x2   :  { %v58_v1 = vld [vmem:[%s3408_s0 + $0x28] sm:$0xff]  ;;  %v60_v5 = vld [vmem:[%s3408_s0 + $0x38] sm:$0xff]  ;;  %v57_v7 = vld [vmem:[%s3408_s0 + $0x20] sm:$0xff]  ;;  %1903 = vset.pattern.permute.xlu0 %v1915_v17  ;;  %1904 = vset.pattern.permute.xlu1 %v1915_v17  ;;  %s1922_s16 = smov 112   ;;  %s1923_s17 = smov 111  }
   0x3   :  { %v1869_v4 = vpack.c.bf16 %v58_v1, %v54_v0  ;;  %v1873_v8 = vpack.c.bf16 %v60_v5, %v56_v2  ;;  %v1871_v9 = vpack.c.bf16 %v57_v7, %v53_v6  ;;  %v55_v10 = vld [vmem:[%s3408_s0 + $0x10] sm:$0xff]  ;;  %v61_v13 = vld [vmem:[%s3409_s1] sm:$0xff]  ;;  %v62_v14 = vld [vmem:[%s3409_s1 + $0x8] sm:$0xff] }
   0x4   :  { %v59_v11 = vld [vmem:[%s3408_s0 + $0x30] sm:$0xff]  ;;  %v64_v16 = vld [vmem:[%s3409_s1 + $0x18] sm:$0xff]  ;;  %v256_v18 = vld [vmem:[%s3410_s2] sm:$0xff] }
   0x5   :  { %1870 = vmatprep.subr.bf16.mxu0 %v1869_v4  ;;  %v1875_v12 = vpack.c.bf16 %v59_v11, %v55_v10  ;;  %1874 = vmatprep.subr.bf16.mxu1 %v1873_v8  ;;  %v63_v15 = vld [vmem:[%s3409_s1 + $0x10] sm:$0xff]  ;;  %v257_v19 = vld [vmem:[%s3410_s2 + $0x8] sm:$0xff]  ;;  %v276_v20 = vld [vmem:[%s3411_s3] sm:$0xff] }
   0x6   :  { %1872 = vmatpush1.bf16.msra.mxu0 %v1871_v9  ;;  %260 = vperm.xlu0 %1903, %v256_v18   ;;  %v277_v21 = vld [vmem:[%s3411_s3 + $0x8] sm:$0xff]  ;;  %v278_v22 = vld [vmem:[%s3411_s3 + $0x10] sm:$0xff]  ;;  %v279_v24 = vld [vmem:[%s3411_s3 + $0x18] sm:$0xff] }
   0x7   :  { %1876 = vmatpush1.bf16.msra.mxu1 %v1875_v12  ;;  %v280_v33 = vld [vmem:[%s3411_s3 + $0x20] sm:$0xff]  ;;  %v282_v34 = vld [vmem:[%s3411_s3 + $0x30] sm:$0xff]  ;;  %v281_v36 = vld [vmem:[%s3411_s3 + $0x28] sm:$0xff] }
   0x8   :  { %v283_v37 = vld [vmem:[%s3411_s3 + $0x38] sm:$0xff]  ;;  %v316_v0 = vld [vmem:[%s3412_s4] sm:$0xff]  ;;  %v317_v1 = vld [vmem:[%s3412_s4 + $0x8] sm:$0xff]  ;;  %s1919_s3 = smov 1  }
   0x9   :  { %1825 = vmatmul.mubr.msk.f32.vlgmr.msra.gmra.mrb[0].mxu0 %vm65_vm0, %v61_v13  ;;  %v318_v12 = vld [vmem:[%s3413_s5] sm:$0xff] }
   0xa   :  { %1829 = vmatmul.mubr.msk.f32.vlgmr.msra.gmra.mrb[0].mxu1 %vm65_vm0, %v61_v13  ;;  %148 = vmatprep.mubr.f32.mxu0 %v3422_v3  ;;  %v320_v13 = vld [vmem:[%s3413_s5 + $0x10] sm:$0xff] }
   0xb   :  { %237 = vmatprep.mubr.f32.mxu1 %v3422_v3  ;;  %265 = vperm.xlu0 %1903, %v257_v19  }
   0xd   :  { %1826 = vmatmul.mubr.msk.f32.gmra.mrb[2].mxu0 %vm65_vm0, %v62_v14 }
   0xe   :  { %1830 = vmatmul.mubr.msk.f32.gmra.mrb[2].mxu1 %vm65_vm0, %v62_v14  ;;  %154 = vmatprep.mubr.f32.mxu0 %v3422_v3  ;;  %v319_v14 = vld [vmem:[%s3413_s5 + $0x8] sm:$0xff] }
   0xf   :  { %243 = vmatprep.mubr.f32.mxu1 %v3422_v3 }
  0x11   :  { %1827 = vmatmul.mubr.msk.f32.gmra.mrb[4].mxu0 %vm65_vm0, %v63_v15 }
  0x12   :  { %1831 = vmatmul.mubr.msk.f32.gmra.mrb[4].mxu1 %vm65_vm0, %v63_v15  ;;  %160 = vmatprep.mubr.f32.mxu0 %v3422_v3  ;;  %v321_v15 = vld [vmem:[%s3413_s5 + $0x18] sm:$0xff] }
  0x13   :  { %249 = vmatprep.mubr.f32.mxu1 %v3422_v3 }
  0x15   :  { %1828 = vmatmul.mubr.msk.f32.gmra.mrb[6].mxu0 %vm65_vm0, %v64_v16 }
  0x16   :  { %1832 = vmatmul.mubr.msk.f32.gmra.mrb[6].mxu1 %vm65_vm0, %v64_v16  ;;  %396 = vmatprep.mubr.f32.mxu0 %v3422_v3 }
  0x17   :  { %473 = vmatprep.mubr.f32.mxu1 %v3422_v3 }
  0x85   :  { %v261_v11 = vpop.permute.xlu0 %260 }
  0xdc   :  { %v144_v23 = vpop.f32.mrb[0].mxu0 }
  0xdd   :  { %v284_v25 = vadd.f32 %v276_v20, %v144_v23  ;;  %v146_v26 = vpop.f32.mrb[1].mxu0  ;;  %v233_v27 = vpop.f32.mrb[0].mxu1 }
  0xde   :  { %v285_v28 = vadd.f32 %v277_v21, %v146_v26  ;;  %v286_v29 = vadd.f32 %v278_v22, %v233_v27  ;;  %v235_v30 = vpop.f32.mrb[1].mxu1  ;;  %v322_v27 = vld [vmem:[%s3413_s5 + $0x20] sm:$0xff] }
  0xdf   :  { %vm292_vm1 = vcmp.ge.f32.partialorder %v284_v25, 0.0  ;;  %v300_v31 = vmul.f32 0.2, %v284_v25  ;;  %v287_v32 = vadd.f32 %v279_v24, %v235_v30 }
  0xe0   :  { %vm294_vm2 = vcmp.ge.f32.partialorder %v286_v29, 0.0  ;;  %v302_v35 = vmul.f32 0.2, %v286_v29  ;;  %vm293_vm3 = vcmp.ge.f32.partialorder %v285_v28, 0.0  ;;  %v301_v38 = vmul.f32 0.2, %v285_v28 }
  0xe1   :  { %v150_v39 = vpop.f32.mrb[2].mxu0  ;;  %v239_v40 = vpop.f32.mrb[2].mxu1  ;;  %v308_v41 = vsel %vm292_vm1, %v284_v25, %v300_v31  ;;  %v303_v42 = vmul.f32 0.2, %v287_v32  ;;  %vm295_vm4 = vcmp.ge.f32.partialorder %v287_v32, 0.0 }
  0xe2   :  { %v288_v43 = vadd.f32 %v280_v33, %v150_v39  ;;  %v290_v44 = vadd.f32 %v282_v34, %v239_v40  ;;  %v152_v45 = vpop.f32.mrb[3].mxu0  ;;  %v241_v46 = vpop.f32.mrb[3].mxu1  ;;  %v310_v47 = vsel %vm294_vm2, %v286_v29, %v302_v35  ;;  %v309_v56 = vsel %vm293_vm3, %v285_v28, %v301_v38  ;;  %v324_v28 = vld [vmem:[%s3413_s5 + $0x30] sm:$0xff]  ;;  %v323_v39 = vld [vmem:[%s3413_s5 + $0x28] sm:$0xff]  ;;  %v325_v40 = vld [vmem:[%s3413_s5 + $0x38] sm:$0xff]  ;;  %s1917_s5 = smov 16  }
  0xe3   :  { %v289_v48 = vadd.f32 %v281_v36, %v152_v45  ;;  %v291_v49 = vadd.f32 %v283_v37, %v241_v46  ;;  %v311_v57 = vsel %vm295_vm4, %v287_v32, %v303_v42  ;;  %v266_v29 = vpop.permute.xlu0 %265 }
  0xe4   :  { %vm296_vm5 = vcmp.ge.f32.partialorder %v288_v43, 0.0  ;;  %v304_v50 = vmul.f32 0.2, %v288_v43  ;;  %vm298_vm6 = vcmp.ge.f32.partialorder %v290_v44, 0.0  ;;  %v306_v51 = vmul.f32 0.2, %v290_v44 }
  0xe5   :  { %vm297_vm7 = vcmp.ge.f32.partialorder %v289_v48, 0.0  ;;  %v305_v52 = vmul.f32 0.2, %v289_v48  ;;  %vm299_vm8 = vcmp.ge.f32.partialorder %v291_v49, 0.0  ;;  %v307_v53 = vmul.f32 0.2, %v291_v49 }
  0xe6   :  { %v312_v54 = vsel %vm296_vm5, %v288_v43, %v304_v50  ;;  %v314_v55 = vsel %vm298_vm6, %v290_v44, %v306_v51  ;;  %v156_v2 = vpop.f32.mrb[4].mxu0  ;;  %v245_v4 = vpop.f32.mrb[4].mxu1 }
  0xe7   :  { %v1879_v58 = vpack.c.bf16 %v312_v54, %v308_v41  ;;  %v1883_v59 = vpack.c.bf16 %v314_v55, %v310_v47  ;;  %v313_v60 = vsel %vm297_vm7, %v289_v48, %v305_v52  ;;  %v315_v61 = vsel %vm299_vm8, %v291_v49, %v307_v53  ;;  %v158_v5 = vpop.f32.mrb[5].mxu0  ;;  %v247_v6 = vpop.f32.mrb[5].mxu1 }
  0xe8   :  { %v1877_v62 = vpack.c.bf16 %v313_v60, %v309_v56  ;;  %v1881_v63 = vpack.c.bf16 %v315_v61, %v311_v57  ;;  %v162_v7 = vpop.f32.mrb[6].mxu0  ;;  %v268_v21 = vadd.f32 %v261_v11, %v156_v2  ;;  %v269_v24 = vadd.f32 %v261_v11, %v158_v5 }
  0xe9   :  { %v251_v8 = vpop.f32.mrb[6].mxu1  ;;  %v2091_v9 = vpop.f32.mrb[7].mxu0  ;;  %v270_v25 = vadd.f32 %v261_v11, %v245_v4  ;;  %v271_v36 = vadd.f32 %v261_v11, %v247_v6  ;;  %v272_v41 = vadd.f32 %v266_v29, %v162_v7  ;;  %v1907_v11 = vld [vmem:[%s3414_s6 + $0x4] ss:$8 sps:$4 sm:$0xff]  }
  0xea   :  { %1878 = vmatprep.subr.bf16.mxu0 %v1877_v62  ;;  %1882 = vmatprep.subr.bf16.mxu1 %v1881_v63  ;;  %v2093_v10 = vpop.f32.mrb[7].mxu1  ;;  %v274_v54 = vadd.f32 %v266_v29, %v251_v8  ;;  %v273_v61 = vadd.f32 %v266_v29, %v2091_v9 }
  0xeb   :  { %1880 = vmatpush1.bf16.msra.mxu0 %v1879_v58  ;;  %1884 = vmatpush1.bf16.msra.mxu1 %v1883_v59  ;;  %v275_v62 = vadd.f32 %v266_v29, %v2093_v10 }
  0xee   :  { %1833 = vmatmul.mubr.msk.f32.vlgmr.msra.gmra.mrb[8].mxu0 %vm65_vm0, %v316_v0  ;;  %1835 = vmatmul.mubr.msk.f32.vlgmr.msra.gmra.mrb[8].mxu1 %vm65_vm0, %v316_v0 }
  0xef   :  { %402 = vmatprep.mubr.f32.mxu0 %v3422_v3  ;;  %479 = vmatprep.mubr.f32.mxu1 %v3422_v3 }
  0xf2   :  { %1834 = vmatmul.mubr.msk.f32.gmra.mrb[10].mxu0 %vm65_vm0, %v317_v1  ;;  %1836 = vmatmul.mubr.msk.f32.gmra.mrb[10].mxu1 %vm65_vm0, %v317_v1 }
  0xf3   :  { %1843 = vmatprep.mubr.msk.bf16.mxu0 %vm65_vm0, %v1907_v11  ;;  %1844 = vmatprep.mubr.msk.bf16.mxu1 %vm65_vm0, %v1907_v11 }
 0x1c1   :  { %v398_v16 = vpop.f32.mrb[8].mxu0  ;;  %v475_v17 = vpop.f32.mrb[8].mxu1 }
 0x1c2   :  { %v399_v18 = vadd.f32 %v398_v16, %v318_v12  ;;  %v476_v19 = vadd.f32 %v475_v17, %v320_v13  ;;  %v400_v20 = vpop.f32.mrb[9].mxu0  ;;  %v477_v22 = vpop.f32.mrb[9].mxu1 }
 0x1c3   :  { %v401_v23 = vadd.f32 %v400_v20, %v319_v14  ;;  %v478_v26 = vadd.f32 %v477_v22, %v321_v15 }
 0x1c4   :  { %vm486_vm9 = vcmp.ge.f32.partialorder %v399_v18, 0.0  ;;  %v494_v30 = vmul.f32 0.2, %v399_v18  ;;  %vm488_vm10 = vcmp.ge.f32.partialorder %v476_v19, 0.0  ;;  %v496_v31 = vmul.f32 0.2, %v476_v19 }
 0x1c5   :  { %vm487_vm11 = vcmp.ge.f32.partialorder %v401_v23, 0.0  ;;  %v495_v32 = vmul.f32 0.2, %v401_v23  ;;  %vm489_vm12 = vcmp.ge.f32.partialorder %v478_v26, 0.0  ;;  %v497_v33 = vmul.f32 0.2, %v478_v26 }
 0x1c6   :  { %v502_v34 = vsel %vm486_vm9, %v399_v18, %v494_v30  ;;  %v504_v35 = vsel %vm488_vm10, %v476_v19, %v496_v31  ;;  %v404_v37 = vpop.f32.mrb[10].mxu0  ;;  %v481_v38 = vpop.f32.mrb[10].mxu1 }
 0x1c7   :  { %v503_v42 = vsel %vm487_vm11, %v401_v23, %v495_v32  ;;  %v2119_v43 = vadd.f32 %v502_v34, %v268_v21  ;;  %v2121_v44 = vadd.f32 %v504_v35, %v270_v25  ;;  %v505_v45 = vsel %vm489_vm12, %v478_v26, %v497_v33  ;;  %v406_v46 = vpop.f32.mrb[11].mxu0  ;;  %v483_v47 = vpop.f32.mrb[11].mxu1 }
 0x1c8   :  { %v2123_v48 = vadd.f32 %v503_v42, %v269_v24  ;;  %v2125_v49 = vadd.f32 %v505_v45, %v271_v36  ;;  %v405_v50 = vadd.f32 %v404_v37, %v322_v27  ;;  %v482_v51 = vadd.f32 %v481_v38, %v324_v28 }
 0x1c9   :  { %v407_v52 = vadd.f32 %v406_v46, %v323_v39  ;;  %v484_v53 = vadd.f32 %v483_v47, %v325_v40  ;;  %528 = vrot.lane.b32.xlu0 %v2121_v44, %s1916_s29  ;;  %520 = vrot.lane.b32.xlu1 %v2119_v43, %s1916_s29  ;;  %v536_v38 = vlaneseq  ;;  %v2326_v46 = vld [vmem:[%s3415_s12 + $0x8] sm:$0xff] }
 0x1ca   :  { %vm490_vm13 = vcmp.ge.f32.partialorder %v405_v50, 0.0  ;;  %v498_v55 = vmul.f32 0.2, %v405_v50  ;;  %vm492_vm14 = vcmp.ge.f32.partialorder %v482_v51, 0.0  ;;  %v500_v56 = vmul.f32 0.2, %v482_v51 }
 0x1cb   :  { %vm491_vm15 = vcmp.ge.f32.partialorder %v407_v52, 0.0  ;;  %v499_v57 = vmul.f32 0.2, %v407_v52  ;;  %vm493_vm1 = vcmp.ge.f32.partialorder %v484_v53, 0.0  ;;  %v501_v58 = vmul.f32 0.2, %v484_v53 }
 0x1cc   :  { %v506_v59 = vsel %vm490_vm13, %v405_v50, %v498_v55  ;;  %v508_v60 = vsel %vm492_vm14, %v482_v51, %v500_v56  ;;  %v2316_v40 = vshrl.u32 %v536_v38, 7  ;;  %v2318_v42 = vand.u32 127, %v536_v38  ;;  %v2337_v51 = vld [vmem:[%s3415_s12] sm:$0xff]  ;;  %v2350_v55 = vld [vmem:[%s3415_s12 + $0x10] sm:$0xff] }
 0x1cd   :  { %v507_v63 = vsel %vm491_vm15, %v407_v52, %v499_v57  ;;  %v509_v0 = vsel %vm493_vm1, %v484_v53, %v501_v58  ;;  %v514_v1 = vadd.f32 %v506_v59, %v272_v41  ;;  %v516_v2 = vadd.f32 %v508_v60, %v274_v54  ;;  %575 = vrot.lane.b32.xlu0 %v2119_v43, %s1917_s5  ;;  %v2345_v54 = vld [vmem:[%s3415_s12 + $0x18] sm:$0xff] }
 0x1ce   :  { %v2135_v4 = vadd.f32 %v507_v63, %v273_v61  ;;  %v2137_v5 = vadd.f32 %v509_v0, %v275_v62  ;;  %vm538_vm2 = vcmp.lt.s32.totalorder %v2318_v42, 17  ;;  %v602_v58 = vsub.s32 1, %v2316_v40 }
 0x1cf   :  { %522 = vrot.lane.b32.xlu1 %v514_v1, %s1916_s29  ;;  %v2141_v6 = vpack.c.bf16 %v514_v1, %v2119_v43  ;;  %v2144_v7 = vpack.c.bf16 %v516_v2, %v2121_v44  ;;  %vm591_vm3 = vcmp.lt.s32.totalorder %v2318_v42, 16  ;;  %vm644_vm4 = vcmp.lt.s32.totalorder %v2318_v42, 15 }
 0x1d0   :  { %vm697_vm5 = vcmp.lt.s32.totalorder %v2318_v42, 1  ;;  %vm754_vm6 = vcmp.lt.s32.totalorder %v2318_v42, 127  ;;  %vm807_vm7 = vcmp.lt.s32.totalorder %v2318_v42, 113  ;;  %vm860_vm8 = vcmp.lt.s32.totalorder %v2318_v42, 112 }
 0x1d1   :  { %3467 = vst [vmem:[#allocation2_spill] sm:$0xff] %v2141_v6  ;;  %3468 = vst [vmem:[#allocation3_spill] sm:$0xff] %v2144_v7  ;;  %583 = vrot.lane.b32.xlu0 %v2121_v44, %s1917_s5  ;;  %vm913_vm9 = vcmp.lt.s32.totalorder %v2318_v42, 111  ;;  %v1911_v42 = vld [vmem:[%s3417_s8 + $0x14] ss:$8 sps:$4 sm:$0xff]  }
 0x1d3   :  { %530 = vrot.lane.b32.xlu1 %v516_v2, %s1916_s29 }
 0x1d5   :  { %628 = vrot.lane.b32.xlu0 %v2119_v43, %s1918_s30 }
 0x1d7   :  { %577 = vrot.lane.b32.xlu1 %v514_v1, %s1917_s5 }
 0x1d9   :  { %636 = vrot.lane.b32.xlu0 %v2121_v44, %s1918_s30 }
 0x1db   :  { %585 = vrot.lane.b32.xlu1 %v516_v2, %s1917_s5 }
 0x1dd   :  { %681 = vrot.lane.b32.xlu0 %v2119_v43, %s1919_s3 }
 0x1df   :  { %630 = vrot.lane.b32.xlu1 %v514_v1, %s1918_s30 }
 0x1e1   :  { %689 = vrot.lane.b32.xlu0 %v2121_v44, %s1919_s3 }
 0x1e3   :  { %638 = vrot.lane.b32.xlu1 %v516_v2, %s1918_s30 }
 0x1e5   :  { %738 = vrot.lane.b32.xlu0 %v2119_v43, %s1920_s14 }
 0x1e7   :  { %683 = vrot.lane.b32.xlu1 %v514_v1, %s1919_s3 }
 0x1e9   :  { %746 = vrot.lane.b32.xlu0 %v2121_v44, %s1920_s14 }
 0x1eb   :  { %691 = vrot.lane.b32.xlu1 %v516_v2, %s1919_s3 }
 0x1ed   :  { %791 = vrot.lane.b32.xlu0 %v2119_v43, %s1921_s15 }
 0x1ef   :  { %740 = vrot.lane.b32.xlu1 %v514_v1, %s1920_s14 }
 0x1f1   :  { %799 = vrot.lane.b32.xlu0 %v2121_v44, %s1921_s15 }
 0x1f3   :  { %748 = vrot.lane.b32.xlu1 %v516_v2, %s1920_s14 }
 0x1f5   :  { %844 = vrot.lane.b32.xlu0 %v2119_v43, %s1922_s16 }
 0x1f7   :  { %793 = vrot.lane.b32.xlu1 %v514_v1, %s1921_s15 }
 0x1f9   :  { %852 = vrot.lane.b32.xlu0 %v2121_v44, %s1922_s16 }
 0x1fb   :  { %801 = vrot.lane.b32.xlu1 %v516_v2, %s1921_s15 }
 0x1fd   :  { %897 = vrot.lane.b32.xlu0 %v2119_v43, %s1923_s17 }
 0x1ff   :  { %846 = vrot.lane.b32.xlu1 %v514_v1, %s1922_s16 }
 0x201   :  { %905 = vrot.lane.b32.xlu0 %v2121_v44, %s1923_s17  ;;  %v549_v44 = vsub.s32 0, %v2316_v40 }
 0x203   :  { %854 = vrot.lane.b32.xlu1 %v516_v2, %s1922_s16  ;;  %v2332_v50 = vrot.slane %v2326_v46, %v549_v44  ;;  %v2353_v57 = vrot.slane %v2337_v51, %v549_v44  ;;  %v2361_v61 = vrot.slane %v2345_v54, %v549_v44 }
 0x205   :  { %524 = vrot.lane.b32.xlu0 %v2123_v48, %s1916_s29  ;;  %3470 = vst [vmem:[#allocation5_spill] sm:$0xff] %v2332_v50 }
 0x207   :  { %899 = vrot.lane.b32.xlu1 %v514_v1, %s1923_s17  ;;  %v2368_v1 = vrot.slane %v2350_v55, %v549_v44 }
 0x209   :  { %532 = vrot.lane.b32.xlu0 %v2125_v49, %s1916_s29 }
 0x20b   :  { %907 = vrot.lane.b32.xlu1 %v516_v2, %s1923_s17 }
 0x20d   :  { %579 = vrot.lane.b32.xlu0 %v2123_v48, %s1917_s5 }
 0x20f   :  { %526 = vrot.lane.b32.xlu1 %v2135_v4, %s1916_s29 }
 0x211   :  { %587 = vrot.lane.b32.xlu0 %v2125_v49, %s1917_s5 }
 0x213   :  { %534 = vrot.lane.b32.xlu1 %v2137_v5, %s1916_s29 }
 0x215   :  { %632 = vrot.lane.b32.xlu0 %v2123_v48, %s1918_s30 }
 0x217   :  { %581 = vrot.lane.b32.xlu1 %v2135_v4, %s1917_s5 }
 0x219   :  { %640 = vrot.lane.b32.xlu0 %v2125_v49, %s1918_s30 }
 0x21b   :  { %589 = vrot.lane.b32.xlu1 %v2137_v5, %s1917_s5 }
 0x21d   :  { %685 = vrot.lane.b32.xlu0 %v2123_v48, %s1919_s3 }
 0x21f   :  { %634 = vrot.lane.b32.xlu1 %v2135_v4, %s1918_s30 }
 0x221   :  { %693 = vrot.lane.b32.xlu0 %v2125_v49, %s1919_s3 }
 0x223   :  { %642 = vrot.lane.b32.xlu1 %v2137_v5, %s1918_s30 }
 0x225   :  { %742 = vrot.lane.b32.xlu0 %v2123_v48, %s1920_s14 }
 0x227   :  { %687 = vrot.lane.b32.xlu1 %v2135_v4, %s1919_s3 }
 0x229   :  { %750 = vrot.lane.b32.xlu0 %v2125_v49, %s1920_s14 }
 0x22b   :  { %695 = vrot.lane.b32.xlu1 %v2137_v5, %s1919_s3 }
 0x22d   :  { %795 = vrot.lane.b32.xlu0 %v2123_v48, %s1921_s15 }
 0x22f   :  { %744 = vrot.lane.b32.xlu1 %v2135_v4, %s1920_s14 }
 0x231   :  { %803 = vrot.lane.b32.xlu0 %v2125_v49, %s1921_s15 }
 0x233   :  { %752 = vrot.lane.b32.xlu1 %v2137_v5, %s1920_s14 }
 0x235   :  { %848 = vrot.lane.b32.xlu0 %v2123_v48, %s1922_s16 }
 0x237   :  { %797 = vrot.lane.b32.xlu1 %v2135_v4, %s1921_s15 }
 0x239   :  { %856 = vrot.lane.b32.xlu0 %v2125_v49, %s1922_s16 }
 0x23b   :  { %805 = vrot.lane.b32.xlu1 %v2137_v5, %s1921_s15  ;;  %v2239_v8 = vpop.permute.xlu0 %528  ;;  %v2241_v9 = vpop.permute.xlu1 %520 }
 0x23d   :  { %901 = vrot.lane.b32.xlu0 %v2123_v48, %s1923_s17 }
 0x23f   :  { %850 = vrot.lane.b32.xlu1 %v2135_v4, %s1922_s16  ;;  %v2247_v10 = vpop.permute.xlu0 %575 }
 0x241   :  { %v2252_v12 = vpop.permute.xlu1 %522  ;;  %909 = vrot.lane.b32.xlu0 %v2125_v49, %s1923_s17 }
 0x243   :  { %858 = vrot.lane.b32.xlu1 %v2137_v5, %s1922_s16  ;;  %v2260_v13 = vpop.permute.xlu0 %583 }
 0x245   :  { %v2262_v14 = vpop.permute.xlu1 %530 }
 0x247   :  { %903 = vrot.lane.b32.xlu1 %v2135_v4, %s1923_s17  ;;  %v2266_v15 = vpop.permute.xlu0 %628 }
 0x249   :  { %v2268_v16 = vpop.permute.xlu1 %577 }
 0x24b   :  { %911 = vrot.lane.b32.xlu1 %v2137_v5, %s1923_s17  ;;  %v2272_v17 = vpop.permute.xlu0 %636 }
 0x24d   :  { %v2274_v18 = vpop.permute.xlu1 %585 }
 0x24f   :  { %v2276_v19 = vpop.permute.xlu0 %681 }
 0x251   :  { %v2278_v20 = vpop.permute.xlu1 %630 }
 0x253   :  { %v2280_v21 = vpop.permute.xlu0 %689 }
 0x255   :  { %v2282_v22 = vpop.permute.xlu1 %638 }
 0x257   :  { %v2284_v23 = vpop.permute.xlu0 %738 }
 0x259   :  { %v2286_v24 = vpop.permute.xlu1 %683 }
 0x25b   :  { %v2288_v25 = vpop.permute.xlu0 %746 }
 0x25d   :  { %v2290_v26 = vpop.permute.xlu1 %691 }
 0x25f   :  { %v2292_v27 = vpop.permute.xlu0 %791 }
 0x261   :  { %v2294_v28 = vpop.permute.xlu1 %740 }
 0x263   :  { %v2296_v29 = vpop.permute.xlu0 %799 }
 0x265   :  { %v2298_v30 = vpop.permute.xlu1 %748 }
 0x267   :  { %v2300_v31 = vpop.permute.xlu0 %844 }
 0x269   :  { %v2302_v32 = vpop.permute.xlu1 %793 }
 0x26b   :  { %v2304_v33 = vpop.permute.xlu0 %852 }
 0x26d   :  { %v2306_v34 = vpop.permute.xlu1 %801 }
 0x26f   :  { %v2308_v35 = vpop.permute.xlu0 %897 }
 0x271   :  { %v2310_v36 = vpop.permute.xlu1 %846 }
 0x273   :  { %v2312_v37 = vpop.permute.xlu0 %905 }
 0x275   :  { %v2314_v39 = vpop.permute.xlu1 %854 }
 0x277   :  { %v525_v41 = vpop.permute.xlu0 %524 }
 0x278   :  { %v543_v53 = vsel %vm538_vm2, %v2241_v9, %v525_v41  ;;  %v541_v38 = vsel %vm538_vm2, %v525_v41, %v2239_v8 }
 0x279   :  { %v2320_v43 = vpop.permute.xlu1 %899  ;;  %v564_v60 = vmul.f32 %v2332_v50, %v543_v53 }
 0x27a   :  { %3469 = vst [vmem:[#allocation4_spill] sm:$0xff] %v2320_v43 }
 0x27b   :  { %v533_v45 = vpop.permute.xlu0 %532 }
 0x27c   :  { %v539_v2 = vsel %vm538_vm2, %v2239_v8, %v533_v45  ;;  %v545_v11 = vsel %vm538_vm2, %v533_v45, %v2241_v9 }
 0x27d   :  { %v2329_v47 = vpop.permute.xlu1 %907  ;;  %v563_v45 = vmul.f32 %v2353_v57, %v545_v11  ;;  %v566_v8 = vmul.f32 %v2361_v61, %v539_v2  ;;  %v2402_v2 = vrot.slane %v2345_v54, %v602_v58 }
 0x27f   :  { %v580_v52 = vpop.permute.xlu0 %579 }
 0x281   :  { %v527_v56 = vpop.permute.xlu1 %526 }
 0x282   :  { %v544_v59 = vsel %vm538_vm2, %v2252_v12, %v527_v56  ;;  %v542_v62 = vsel %vm538_vm2, %v527_v56, %v2262_v14 }
 0x283   :  { %v568_v63 = vmul.f32 %v2332_v50, %v544_v59  ;;  %v588_v0 = vpop.permute.xlu0 %587  ;;  %v2381_v59 = vrot.slane %v2326_v46, %v602_v58  ;;  %v569_v44 = vmul.f32 %v2368_v1, %v542_v62  ;;  %v565_v62 = vmul.f32 %v2368_v1, %v541_v38 }
 0x284   :  { %v2399_v50 = vrot.slane %v2337_v51, %v602_v58 }
 0x285   :  { %v535_v53 = vpop.permute.xlu1 %534  ;;  %v572_v56 = vpack.c.bf16 %v568_v63, %v564_v60  ;;  %v573_v43 = vpack.c.bf16 %v569_v44, %v565_v62  ;;  %v594_v62 = vsel %vm591_vm3, %v580_v52, %v2260_v13 }
 0x286   :  { %v540_v3 = vsel %vm538_vm2, %v2262_v14, %v535_v53  ;;  %v546_v9 = vsel %vm538_vm2, %v535_v53, %v2252_v12  ;;  %v596_v14 = vsel %vm591_vm3, %v2247_v10, %v580_v52 }
 0x287   :  { %v567_v41 = vmul.f32 %v2353_v57, %v546_v9  ;;  %v570_v60 = vmul.f32 %v2361_v61, %v540_v3  ;;  %970 = vmatprep.subr.bf16.mxu0 %v572_v56  ;;  %v633_v63 = vpop.permute.xlu0 %632  ;;  %v655_v3 = vsub.s32 2, %v2316_v40  ;;  %v617_v56 = vmul.f32 %v2381_v59, %v596_v14 }
 0x289   :  { %v571_v12 = vpack.c.bf16 %v567_v41, %v563_v45  ;;  %v582_v53 = vpop.permute.xlu1 %581  ;;  %v574_v11 = vpack.c.bf16 %v570_v60, %v566_v8  ;;  %v2414_v8 = vrot.slane %v2350_v55, %v602_v58  ;;  %v592_v41 = vsel %vm591_vm3, %v2260_v13, %v588_v0 }
 0x28a   :  { %v597_v38 = vsel %vm591_vm3, %v2268_v16, %v582_v53  ;;  %v595_v9 = vsel %vm591_vm3, %v582_v53, %v2274_v18  ;;  %v598_v60 = vsel %vm591_vm3, %v588_v0, %v2247_v10  ;;  %v2427_v58 = vrot.slane %v2326_v46, %v655_v3 }
 0x28b   :  { %v621_v45 = vmul.f32 %v2381_v59, %v597_v38  ;;  %971 = vmatpush1.bf16.msra.mxu0 %v571_v12  ;;  %1013 = vmatprep.subr.bf16.mxu1 %v574_v11  ;;  %v641_v44 = vpop.permute.xlu0 %640  ;;  %v622_v53 = vmul.f32 %v2414_v8, %v595_v9  ;;  %v619_v13 = vmul.f32 %v2402_v2, %v592_v41 }
 0x28c   :  { %1014 = vmatpush1.bf16.msra.mxu1 %v573_v43  ;;  %v616_v43 = vmul.f32 %v2399_v50, %v598_v60  ;;  %v2445_v9 = vrot.slane %v2337_v51, %v655_v3  ;;  %v2448_v41 = vrot.slane %v2345_v54, %v655_v3 }
 0x28d   :  { %v590_v14 = vpop.permute.xlu1 %589  ;;  %v625_v12 = vpack.c.bf16 %v621_v45, %v617_v56  ;;  %v618_v56 = vmul.f32 %v2414_v8, %v594_v62 }
 0x28e   :  { %v593_v11 = vsel %vm591_vm3, %v2274_v18, %v590_v14  ;;  %v599_v10 = vsel %vm591_vm3, %v590_v14, %v2268_v16  ;;  %v649_v18 = vsel %vm644_vm4, %v2266_v15, %v633_v63 }
 0x28f   :  { %v620_v52 = vmul.f32 %v2399_v50, %v599_v10  ;;  %v623_v0 = vmul.f32 %v2402_v2, %v593_v11  ;;  %972 = vmatprep.subr.bf16.mxu0 %v625_v12  ;;  %v686_v38 = vpop.permute.xlu0 %685  ;;  %v626_v14 = vpack.c.bf16 %v622_v53, %v618_v56  ;;  %v708_v11 = vsub.s32 3, %v2316_v40 }
 0x290   :  { %v670_v12 = vmul.f32 %v2427_v58, %v649_v18  ;;  %v647_v56 = vsel %vm644_vm4, %v633_v63, %v2272_v17 }
 0x291   :  { %v624_v16 = vpack.c.bf16 %v620_v52, %v616_v43  ;;  %v635_v45 = vpop.permute.xlu1 %634  ;;  %v627_v60 = vpack.c.bf16 %v623_v0, %v619_v13  ;;  %v2460_v13 = vrot.slane %v2350_v55, %v655_v3  ;;  %v645_v52 = vsel %vm644_vm4, %v2272_v17, %v641_v44 }
 0x292   :  { %v650_v62 = vsel %vm644_vm4, %v2278_v20, %v635_v45  ;;  %v648_v10 = vsel %vm644_vm4, %v635_v45, %v2282_v22  ;;  %v651_v0 = vsel %vm644_vm4, %v641_v44, %v2266_v15  ;;  %v2473_v3 = vrot.slane %v2326_v46, %v708_v11 }
 0x293   :  { %v674_v43 = vmul.f32 %v2427_v58, %v650_v62  ;;  %973 = vmatpush1.bf16.msra.mxu0 %v624_v16  ;;  %1015 = vmatprep.subr.bf16.mxu1 %v627_v60  ;;  %v694_v53 = vpop.permute.xlu0 %693  ;;  %v675_v45 = vmul.f32 %v2460_v13, %v648_v10  ;;  %v669_v44 = vmul.f32 %v2445_v9, %v651_v0 }
 0x294   :  { %1016 = vmatpush1.bf16.msra.mxu1 %v626_v14  ;;  %v672_v17 = vmul.f32 %v2448_v41, %v645_v52  ;;  %v2491_v10 = vrot.slane %v2337_v51, %v708_v11  ;;  %v2494_v52 = vrot.slane %v2345_v54, %v708_v11 }
 0x295   :  { %v643_v18 = vpop.permute.xlu1 %642  ;;  %v678_v16 = vpack.c.bf16 %v674_v43, %v670_v12  ;;  %v671_v12 = vmul.f32 %v2460_v13, %v647_v56 }
 0x296   :  { %v646_v60 = vsel %vm644_vm4, %v2282_v22, %v643_v18  ;;  %v652_v15 = vsel %vm644_vm4, %v643_v18, %v2278_v20  ;;  %v702_v22 = vsel %vm697_vm5, %v2276_v19, %v686_v38 }
 0x297   :  { %v673_v63 = vmul.f32 %v2445_v9, %v652_v15  ;;  %v676_v14 = vmul.f32 %v2448_v41, %v646_v60  ;;  %974 = vmatprep.subr.bf16.mxu0 %v678_v16  ;;  %v743_v62 = vpop.permute.xlu0 %742  ;;  %v679_v18 = vpack.c.bf16 %v675_v45, %v671_v12  ;;  %v765_v60 = vsub.s32 5, %v2316_v40 }
 0x298   :  { %v723_v16 = vmul.f32 %v2473_v3, %v702_v22  ;;  %v2516_v12 = vpack.c.bf16 %v2135_v4, %v2123_v48  ;;  %v700_v22 = vsel %vm697_vm5, %v686_v38, %v2280_v21 }
 0x299   :  { %v677_v20 = vpack.c.bf16 %v673_v63, %v669_v44  ;;  %v688_v43 = vpop.permute.xlu1 %687  ;;  %v680_v0 = vpack.c.bf16 %v676_v14, %v672_v17  ;;  %v2506_v17 = vrot.slane %v2350_v55, %v708_v11  ;;  %v698_v63 = vsel %vm697_vm5, %v2280_v21, %v694_v53 }
 0x29a   :  { %v703_v56 = vsel %vm697_vm5, %v2286_v24, %v688_v43  ;;  %v701_v15 = vsel %vm697_vm5, %v688_v43, %v2290_v26  ;;  %v704_v14 = vsel %vm697_vm5, %v694_v53, %v2276_v19  ;;  %3471 = vst [vmem:[#allocation6_spill] sm:$0xff] %v2516_v12  ;;  %v2524_v43 = vpack.c.bf16 %v2137_v5, %v2125_v49 }
 0x29b   :  { %v727_v44 = vmul.f32 %v2473_v3, %v703_v56  ;;  %975 = vmatpush1.bf16.msra.mxu0 %v677_v20  ;;  %1017 = vmatprep.subr.bf16.mxu1 %v680_v0  ;;  %v751_v45 = vpop.permute.xlu0 %750  ;;  %v2527_v0 = vrot.slane %v2326_v46, %v765_v60  ;;  %v728_v19 = vmul.f32 %v2506_v17, %v701_v15 }
 0x29c   :  { %1018 = vmatpush1.bf16.msra.mxu1 %v679_v18  ;;  %3472 = vst [vmem:[#allocation7_spill] sm:$0xff] %v2524_v43  ;;  %v722_v21 = vmul.f32 %v2491_v10, %v704_v14  ;;  %v725_v38 = vmul.f32 %v2494_v52, %v698_v63  ;;  %v724_v18 = vmul.f32 %v2506_v17, %v700_v22 }
 0x29d   :  { %v696_v11 = vpop.permute.xlu1 %695  ;;  %v731_v20 = vpack.c.bf16 %v727_v44, %v723_v16  ;;  %v2542_v56 = vrot.slane %v2337_v51, %v765_v60  ;;  %v2551_v16 = vrot.slane %v2345_v54, %v765_v60  ;;  %v818_v44 = vsub.s32 6, %v2316_v40 }
 0x29e   :  { %v699_v48 = vsel %vm697_vm5, %v2290_v26, %v696_v11  ;;  %v705_v4 = vsel %vm697_vm5, %v696_v11, %v2286_v24  ;;  %v757_v26 = vsel %vm754_vm6, %v743_v62, %v2288_v25  ;;  %v2548_v24 = vrot.slane %v2350_v55, %v765_v60 }
 0x29f   :  { %v726_v49 = vmul.f32 %v2491_v10, %v705_v4  ;;  %v729_v5 = vmul.f32 %v2494_v52, %v699_v48  ;;  %976 = vmatprep.subr.bf16.mxu0 %v731_v20  ;;  %v796_v53 = vpop.permute.xlu0 %795  ;;  %v759_v22 = vsel %vm754_vm6, %v2284_v23, %v743_v62  ;;  %v732_v11 = vpack.c.bf16 %v728_v19, %v724_v18 }
 0x2a0   :  { %v780_v60 = vmul.f32 %v2527_v0, %v757_v26  ;;  %v755_v4 = vsel %vm754_vm6, %v2288_v25, %v751_v45  ;;  %v761_v19 = vsel %vm754_vm6, %v751_v45, %v2284_v23  ;;  %v779_v26 = vmul.f32 %v2542_v56, %v759_v22 }
 0x2a1   :  { %v730_v15 = vpack.c.bf16 %v726_v49, %v722_v21  ;;  %v745_v63 = vpop.permute.xlu1 %744  ;;  %v733_v14 = vpack.c.bf16 %v729_v5, %v725_v38  ;;  %v2574_v38 = vrot.slane %v2337_v51, %v818_v44  ;;  %v2577_v49 = vrot.slane %v2326_v46, %v818_v44 }
 0x2a2   :  { %v758_v20 = vsel %vm754_vm6, %v745_v63, %v2298_v30  ;;  %v760_v48 = vsel %vm754_vm6, %v2294_v28, %v745_v63  ;;  %v781_v23 = vmul.f32 %v2548_v24, %v755_v4  ;;  %v782_v63 = vmul.f32 %v2551_v16, %v761_v19 }
 0x2a3   :  { %v784_v21 = vmul.f32 %v2527_v0, %v758_v20  ;;  %977 = vmatpush1.bf16.msra.mxu0 %v730_v15  ;;  %1019 = vmatprep.subr.bf16.mxu1 %v733_v14  ;;  %v804_v62 = vpop.permute.xlu0 %803  ;;  %3473 = vst [vmem:[#allocation8_spill] sm:$0xff] %v2574_v38  ;;  %3474 = vst [vmem:[#allocation9_spill] sm:$0xff] %v2577_v49  ;;  %v783_v25 = vmul.f32 %v2542_v56, %v760_v48 }
 0x2a4   :  { %978 = vmatprep.subr.bf16.mxu0 %v2516_v12  ;;  %1020 = vmatpush1.bf16.msra.mxu1 %v732_v11  ;;  %v812_v14 = vsel %vm807_vm7, %v2292_v27, %v796_v53  ;;  %v2600_v48 = vrot.slane %v2350_v55, %v818_v44 }
 0x2a5   :  { %1021 = vmatprep.subr.bf16.mxu1 %v2524_v43  ;;  %v753_v5 = vpop.permute.xlu1 %752  ;;  %v788_v18 = vpack.c.bf16 %v784_v21, %v780_v60  ;;  %v2604_v60 = vrot.slane %v2345_v54, %v818_v44  ;;  %v1577_v43 = vld [vmem:[%s3418_s11 + $0x18] sm:$0xff] }
 0x2a6   :  { %v756_v45 = vsel %vm754_vm6, %v2298_v30, %v753_v5  ;;  %v762_v15 = vsel %vm754_vm6, %v753_v5, %v2294_v28  ;;  %v810_v30 = vsel %vm807_vm7, %v796_v53, %v2296_v29  ;;  %3475 = vst [vmem:[#allocation10_spill] sm:$0xff] %v2600_v48  ;;  %v787_v28 = vpack.c.bf16 %v783_v25, %v779_v26 }
 0x2a7   :  { %v785_v11 = vmul.f32 %v2548_v24, %v756_v45  ;;  %v786_v22 = vmul.f32 %v2551_v16, %v762_v15  ;;  %979 = vmatpush1.bf16.msra.mxu0 %v2141_v6  ;;  %v849_v20 = vpop.permute.xlu0 %848  ;;  %3476 = vst [vmem:[#allocation11_spill] sm:$0xff] %v2604_v60  ;;  %v832_v5 = vmul.f32 %v2574_v38, %v812_v14  ;;  %v871_v45 = vsub.s32 7, %v2316_v40 }
 0x2a8   :  { %980 = vmatprep.subr.bf16.mxu0 %v788_v18  ;;  %1022 = vmatpush1.bf16.msra.mxu1 %v2144_v7  ;;  %v833_v25 = vmul.f32 %v2577_v49, %v810_v30  ;;  %v808_v40 = vsel %vm807_vm7, %v2296_v29, %v804_v62 }
 0x2a9   :  { %v789_v4 = vpack.c.bf16 %v785_v11, %v781_v23  ;;  %v798_v21 = vpop.permute.xlu1 %797  ;;  %v790_v19 = vpack.c.bf16 %v786_v22, %v782_v63  ;;  %v814_v23 = vsel %vm807_vm7, %v804_v62, %v2292_v27  ;;  %v2625_v22 = vrot.slane %v2337_v51, %v871_v45 }
 0x2aa   :  { %v811_v53 = vsel %vm807_vm7, %v798_v21, %v2306_v34  ;;  %v813_v18 = vsel %vm807_vm7, %v2302_v32, %v798_v21  ;;  %v2628_v30 = vrot.slane %v2326_v46, %v871_v45  ;;  %v834_v62 = vmul.f32 %v2600_v48, %v808_v40 }
 0x2ab   :  { %v836_v44 = vmul.f32 %v2574_v38, %v813_v18  ;;  %v837_v26 = vmul.f32 %v2577_v49, %v811_v53  ;;  %981 = vmatpush1.bf16.msra.mxu0 %v787_v28  ;;  %1023 = vmatprep.subr.bf16.mxu1 %v790_v19  ;;  %v857_v63 = vpop.permute.xlu0 %856  ;;  %3477 = vst [vmem:[#allocation12_spill] sm:$0xff] %v2625_v22 }
 0x2ac   :  { %1024 = vmatpush1.bf16.msra.mxu1 %v789_v4  ;;  %3478 = vst [vmem:[#allocation13_spill] sm:$0xff] %v2628_v30  ;;  %v835_v28 = vmul.f32 %v2604_v60, %v814_v23  ;;  %v863_v46 = vsel %vm860_vm8, %v849_v20, %v2304_v33  ;;  %v2650_v53 = vrot.slane %v2345_v54, %v871_v45 }
 0x2ad   :  { %v840_v15 = vpack.c.bf16 %v836_v44, %v832_v5  ;;  %v806_v14 = vpop.permute.xlu1 %805  ;;  %v841_v11 = vpack.c.bf16 %v837_v26, %v833_v25  ;;  %v2647_v5 = vrot.slane %v2350_v55, %v871_v45  ;;  %v886_v44 = vmul.f32 %v2628_v30, %v863_v46 }
 0x2ae   :  { %v809_v29 = vsel %vm807_vm7, %v2306_v34, %v806_v14  ;;  %v815_v27 = vsel %vm807_vm7, %v806_v14, %v2302_v32  ;;  %v865_v34 = vsel %vm860_vm8, %v2300_v31, %v849_v20  ;;  %3480 = vst [vmem:[#allocation15_spill] sm:$0xff] %v2650_v53  ;;  %v861_v54 = vsel %vm860_vm8, %v2304_v33, %v857_v63 }
 0x2af   :  { %v838_v4 = vmul.f32 %v2600_v48, %v809_v29  ;;  %v839_v51 = vmul.f32 %v2604_v60, %v815_v27  ;;  %982 = vmatprep.subr.bf16.mxu0 %v841_v11  ;;  %3479 = vst [vmem:[#allocation14_spill] sm:$0xff] %v2647_v5  ;;  %v885_v20 = vmul.f32 %v2625_v22, %v865_v34  ;;  %v902_v26 = vpop.permute.xlu0 %901 }
 0x2b0   :  { %983 = vmatpush1.bf16.msra.mxu0 %v840_v15  ;;  %v867_v45 = vsel %vm860_vm8, %v857_v63, %v2300_v31  ;;  %v887_v33 = vmul.f32 %v2647_v5, %v861_v54 }
 0x2b1   :  { %v842_v21 = vpack.c.bf16 %v838_v4, %v834_v62  ;;  %v851_v32 = vpop.permute.xlu1 %850  ;;  %v843_v19 = vpack.c.bf16 %v839_v51, %v835_v28  ;;  %v888_v27 = vmul.f32 %v2650_v53, %v867_v45  ;;  %v2682_v62 = vld [vmem:[%s3415_s12 + $0x20] ss:$0 sm:$0xff]  ;;  %v918_v28 = vsel %vm913_vm9, %v2308_v35, %v902_v26 }
 0x2b2   :  { %v864_v18 = vsel %vm860_vm8, %v851_v32, %v2314_v39  ;;  %v866_v25 = vsel %vm860_vm8, %v2310_v36, %v851_v32  ;;  %3481 = vst [vmem:[#allocation16_spill] sm:$0xff] %v2682_v62  ;;  %v3483_v32 = vld [vmem:[#allocation4_spill] sm:$0xff] }
 0x2b3   :  { %v889_v40 = vmul.f32 %v2625_v22, %v866_v25  ;;  %v890_v55 = vmul.f32 %v2628_v30, %v864_v18  ;;  %1025 = vmatprep.subr.bf16.mxu1 %v843_v19  ;;  %v910_v4 = vpop.permute.xlu0 %909  ;;  %v938_v18 = vmul.f32 %v2682_v62, %v918_v28  ;;  %v954_v28 = vld [vmem:[%s3416_s7 + $0x20] sm:$0xff] }
 0x2b4   :  { %1026 = vmatpush1.bf16.msra.mxu1 %v842_v21  ;;  %v920_v54 = vsel %vm913_vm9, %v910_v4, %v2308_v35 }
 0x2b5   :  { %v893_v23 = vpack.c.bf16 %v889_v40, %v885_v20  ;;  %v859_v15 = vpop.permute.xlu1 %858  ;;  %v894_v14 = vpack.c.bf16 %v890_v55, %v886_v44  ;;  %v2713_v40 = vld [vmem:[%s3415_s12 + $0x38] ss:$0 sm:$0xff]  ;;  %v914_v55 = vsel %vm913_vm9, %v2312_v37, %v910_v4 }
 0x2b6   :  { %v862_v11 = vsel %vm860_vm8, %v2314_v39, %v859_v15  ;;  %v868_v29 = vsel %vm860_vm8, %v859_v15, %v2310_v36  ;;  %v2687_v39 = vld [vmem:[%s3415_s12 + $0x28] ss:$0 sm:$0xff]  ;;  %v916_v36 = vsel %vm913_vm9, %v902_v26, %v2312_v37  ;;  %v2708_v26 = vld [vmem:[%s3415_s12 + $0x30] ss:$0 sm:$0xff]  ;;  %3485 = vst [vmem:[#allocation18_spill] sm:$0xff] %v2713_v40  ;;  %v941_v37 = vmul.f32 %v2713_v40, %v920_v54 }
 0x2b7   :  { %v891_v31 = vmul.f32 %v2647_v5, %v862_v11  ;;  %v892_v63 = vmul.f32 %v2650_v53, %v868_v29  ;;  %984 = vmatprep.subr.bf16.mxu0 %v894_v14  ;;  %3482 = vst [vmem:[#allocation17_spill] sm:$0xff] %v2687_v39  ;;  %v939_v25 = vmul.f32 %v2687_v39, %v916_v36  ;;  %3484 = vst [vmem:[#allocation4_spill] sm:$0xff] %v2708_v26 }
 0x2b8   :  { %985 = vmatpush1.bf16.msra.mxu0 %v893_v23  ;;  %v940_v29 = vmul.f32 %v2708_v26, %v914_v55 }
 0x2b9   :  { %v895_v51 = vpack.c.bf16 %v891_v31, %v887_v33  ;;  %v904_v46 = vpop.permute.xlu1 %903  ;;  %v896_v34 = vpack.c.bf16 %v892_v63, %v888_v27  ;;  %v1905_v27 = vld [vmem:[%s3414_s6] ss:$8 sps:$4 sm:$0xff]  }
 0x2ba   :  { %v917_v21 = vsel %vm913_vm9, %v904_v46, %v2329_v47  ;;  %v919_v19 = vsel %vm913_vm9, %v3483_v32, %v904_v46  ;;  %v950_v63 = vld [vmem:[%s3416_s7] sm:$0xff] }
 0x2bb   :  { %v942_v20 = vmul.f32 %v2682_v62, %v919_v19  ;;  %v943_v44 = vmul.f32 %v2687_v39, %v917_v21  ;;  %1027 = vmatprep.subr.bf16.mxu1 %v896_v34  ;;  %v952_v34 = vld [vmem:[%s3416_s7 + $0x10] sm:$0xff] }
 0x2bc   :  { %1028 = vmatpush1.bf16.msra.mxu1 %v895_v51 }
 0x2bd   :  { %v946_v45 = vpack.c.bf16 %v942_v20, %v938_v18  ;;  %v912_v23 = vpop.permute.xlu1 %911  ;;  %v947_v15 = vpack.c.bf16 %v943_v44, %v939_v25  ;;  %v956_v25 = vld [vmem:[%s3416_s7 + $0x30] sm:$0xff] }
 0x2be   :  { %v915_v14 = vsel %vm913_vm9, %v2329_v47, %v912_v23  ;;  %v921_v11 = vsel %vm913_vm9, %v912_v23, %v3483_v32 }
 0x2bf   :  { %v944_v33 = vmul.f32 %v2708_v26, %v915_v14  ;;  %v945_v35 = vmul.f32 %v2713_v40, %v921_v11  ;;  %986 = vmatprep.subr.bf16.mxu0 %v947_v15 }
 0x2c0   :  { %987 = vmatpush1.bf16.msra.mxu0 %v946_v45 }
 0x2c1   :  { %v948_v31 = vpack.c.bf16 %v944_v33, %v940_v29  ;;  %v949_v47 = vpack.c.bf16 %v945_v35, %v941_v37 }
 0x2c3   :  { %1003 = vmatmul.mubr.bf16.vlgmr.msra.gmra.mrb[12].mxu0 %v1905_v27  ;;  %1029 = vmatprep.subr.bf16.mxu1 %v949_v47  ;;  %v955_v47 = vld [vmem:[%s3416_s7 + $0x28] sm:$0xff] }
 0x2c4   :  { %1030 = vmatpush1.bf16.msra.mxu1 %v948_v31  ;;  %v951_v31 = vld [vmem:[%s3416_s7 + $0x8] sm:$0xff] }
 0x2c7   :  { %1046 = vmatmul.mubr.bf16.vlgmr.msra.gmra.mrb[12].mxu1 %v1905_v27 }
 0x396   :  { %v1004_v36 = vpop.f32.mrb[12].mxu0 }
 0x397   :  { %v1005_v4 = vadd.f32 %v1004_v36, %v950_v63  ;;  %v1006_v51 = vpop.f32.mrb[13].mxu0  ;;  %v953_v36 = vld [vmem:[%s3416_s7 + $0x18] sm:$0xff] }
 0x398   :  { %v1008_v46 = vpop.f32.mrb[14].mxu0  ;;  %v1007_v63 = vadd.f32 %v1006_v51, %v951_v31 }
 0x399   :  { %vm1056_vm10 = vcmp.ge.f32.partialorder %v1005_v4, 0.0  ;;  %v1064_v21 = vmul.f32 0.2, %v1005_v4  ;;  %v1009_v32 = vadd.f32 %v1008_v46, %v954_v28  ;;  %v1010_v19 = vpop.f32.mrb[15].mxu0 }
 0x39a   :  { %v1047_v18 = vpop.f32.mrb[12].mxu1  ;;  %v1011_v28 = vadd.f32 %v1010_v19, %v955_v47  ;;  %v1065_v46 = vmul.f32 0.2, %v1007_v63  ;;  %vm1057_vm14 = vcmp.ge.f32.partialorder %v1007_v63, 0.0  ;;  %v1574_v47 = vld [vmem:[%s3418_s11] sm:$0xff] }
 0x39b   :  { %v2746_v20 = vsel %vm1056_vm10, %v1005_v4, %v1064_v21  ;;  %vm1060_vm11 = vcmp.ge.f32.partialorder %v1009_v32, 0.0  ;;  %v1068_v44 = vmul.f32 0.2, %v1009_v32  ;;  %v1048_v55 = vadd.f32 %v1047_v18, %v952_v34  ;;  %v1049_v54 = vpop.f32.mrb[13].mxu1  ;;  %v957_v4 = vld [vmem:[%s3416_s7 + $0x38] sm:$0xff] }
 0x39c   :  { %v1051_v45 = vpop.f32.mrb[14].mxu1  ;;  %1084 = vrot.lane.b32.xlu0 %v2746_v20, %s1916_s29  ;;  %v1050_v34 = vadd.f32 %v1049_v54, %v953_v36  ;;  %v1069_v51 = vmul.f32 0.2, %v1011_v28  ;;  %vm1061_vm15 = vcmp.ge.f32.partialorder %v1011_v28, 0.0 }
 0x39d   :  { %v2750_v23 = vsel %vm1060_vm11, %v1009_v32, %v1068_v44  ;;  %vm1058_vm12 = vcmp.ge.f32.partialorder %v1048_v55, 0.0  ;;  %v1066_v15 = vmul.f32 0.2, %v1048_v55  ;;  %v1052_v14 = vadd.f32 %v1051_v45, %v956_v25  ;;  %v1053_v11 = vpop.f32.mrb[15].mxu1 }
 0x39e   :  { %1086 = vrot.lane.b32.xlu1 %v2750_v23, %s1916_s29  ;;  %v1054_v21 = vadd.f32 %v1053_v11, %v957_v4  ;;  %v2834_v32 = vsel %vm1057_vm14, %v1007_v63, %v1065_v46  ;;  %v1067_v19 = vmul.f32 0.2, %v1050_v34  ;;  %vm1059_vm1 = vcmp.ge.f32.partialorder %v1050_v34, 0.0 }
 0x39f   :  { %v2754_v29 = vsel %vm1058_vm12, %v1048_v55, %v1066_v15  ;;  %vm1062_vm13 = vcmp.ge.f32.partialorder %v1052_v14, 0.0  ;;  %v1070_v37 = vmul.f32 0.2, %v1052_v14  ;;  %v2838_v18 = vsel %vm1061_vm15, %v1011_v28, %v1069_v51  ;;  %v1908_v15 = vld [vmem:[%s3417_s8 + $0x4] ss:$8 sps:$4 sm:$0xff]   ;;  %v1576_v28 = vld [vmem:[%s3418_s11 + $0x10] sm:$0xff] }
 0x3a0   :  { %3486 = vst [vmem:[#allocation19_spill] sm:$0xff] %v2754_v29  ;;  %1092 = vrot.lane.b32.xlu0 %v2754_v29, %s1916_s29  ;;  %v1071_v25 = vmul.f32 0.2, %v1054_v21  ;;  %vm1063_vm10 = vcmp.ge.f32.partialorder %v1054_v21, 0.0  ;;  %v2842_v44 = vsel %vm1059_vm1, %v1050_v34, %v1067_v19  ;;  %1849 = vmatprep.mubr.msk.bf16.mxu0 %vm65_vm0, %v1908_v15 }
 0x3a1   :  { %v2760_v35 = vsel %vm1062_vm13, %v1052_v14, %v1070_v37  ;;  %1851 = vmatprep.mubr.msk.bf16.mxu1 %vm65_vm0, %v1908_v15 }
 0x3a2   :  { %3487 = vst [vmem:[#allocation20_spill] sm:$0xff] %v2760_v35  ;;  %1094 = vrot.lane.b32.xlu1 %v2760_v35, %s1916_s29  ;;  %v2846_v55 = vsel %vm1063_vm10, %v1054_v21, %v1071_v25 }
 0x3a4   :  { %1120 = vrot.lane.b32.xlu0 %v2746_v20, %s1917_s5 }
 0x3a6   :  { %1122 = vrot.lane.b32.xlu1 %v2750_v23, %s1917_s5 }
 0x3a8   :  { %1128 = vrot.lane.b32.xlu0 %v2754_v29, %s1917_s5 }
 0x3aa   :  { %1130 = vrot.lane.b32.xlu1 %v2760_v35, %s1917_s5 }
 0x3ac   :  { %1156 = vrot.lane.b32.xlu0 %v2746_v20, %s1918_s30 }
 0x3ae   :  { %1158 = vrot.lane.b32.xlu1 %v2750_v23, %s1918_s30 }
 0x3b0   :  { %1164 = vrot.lane.b32.xlu0 %v2754_v29, %s1918_s30 }
 0x3b2   :  { %1166 = vrot.lane.b32.xlu1 %v2760_v35, %s1918_s30 }
 0x3b4   :  { %1192 = vrot.lane.b32.xlu0 %v2746_v20, %s1919_s3 }
 0x3b6   :  { %1194 = vrot.lane.b32.xlu1 %v2750_v23, %s1919_s3 }
 0x3b8   :  { %1200 = vrot.lane.b32.xlu0 %v2754_v29, %s1919_s3 }
 0x3ba   :  { %1202 = vrot.lane.b32.xlu1 %v2760_v35, %s1919_s3 }
 0x3bc   :  { %1232 = vrot.lane.b32.xlu0 %v2746_v20, %s1920_s14 }
 0x3be   :  { %1234 = vrot.lane.b32.xlu1 %v2750_v23, %s1920_s14 }
 0x3c0   :  { %1240 = vrot.lane.b32.xlu0 %v2754_v29, %s1920_s14 }
 0x3c2   :  { %1242 = vrot.lane.b32.xlu1 %v2760_v35, %s1920_s14 }
 0x3c4   :  { %1268 = vrot.lane.b32.xlu0 %v2746_v20, %s1921_s15 }
 0x3c6   :  { %1270 = vrot.lane.b32.xlu1 %v2750_v23, %s1921_s15 }
 0x3c8   :  { %1276 = vrot.lane.b32.xlu0 %v2754_v29, %s1921_s15 }
 0x3ca   :  { %1278 = vrot.lane.b32.xlu1 %v2760_v35, %s1921_s15 }
 0x3cc   :  { %1304 = vrot.lane.b32.xlu0 %v2746_v20, %s1922_s16 }
 0x3ce   :  { %1306 = vrot.lane.b32.xlu1 %v2750_v23, %s1922_s16 }
 0x3d0   :  { %1312 = vrot.lane.b32.xlu0 %v2754_v29, %s1922_s16 }
 0x3d2   :  { %1314 = vrot.lane.b32.xlu1 %v2760_v35, %s1922_s16 }
 0x3d4   :  { %1340 = vrot.lane.b32.xlu0 %v2746_v20, %s1923_s17 }
 0x3d6   :  { %1342 = vrot.lane.b32.xlu1 %v2750_v23, %s1923_s17 }
 0x3d8   :  { %1348 = vrot.lane.b32.xlu0 %v2754_v29, %s1923_s17 }
 0x3da   :  { %1350 = vrot.lane.b32.xlu1 %v2760_v35, %s1923_s17 }
 0x3dc   :  { %1088 = vrot.lane.b32.xlu0 %v2834_v32, %s1916_s29 }
 0x3de   :  { %1090 = vrot.lane.b32.xlu1 %v2838_v18, %s1916_s29 }
 0x3e0   :  { %1096 = vrot.lane.b32.xlu0 %v2842_v44, %s1916_s29 }
 0x3e2   :  { %1098 = vrot.lane.b32.xlu1 %v2846_v55, %s1916_s29 }
 0x3e4   :  { %1124 = vrot.lane.b32.xlu0 %v2834_v32, %s1917_s5 }
 0x3e6   :  { %1126 = vrot.lane.b32.xlu1 %v2838_v18, %s1917_s5 }
 0x3e8   :  { %1132 = vrot.lane.b32.xlu0 %v2842_v44, %s1917_s5 }
 0x3ea   :  { %1134 = vrot.lane.b32.xlu1 %v2846_v55, %s1917_s5 }
 0x3ec   :  { %1160 = vrot.lane.b32.xlu0 %v2834_v32, %s1918_s30 }
 0x3ee   :  { %1162 = vrot.lane.b32.xlu1 %v2838_v18, %s1918_s30 }
 0x3f0   :  { %1168 = vrot.lane.b32.xlu0 %v2842_v44, %s1918_s30 }
 0x3f2   :  { %1170 = vrot.lane.b32.xlu1 %v2846_v55, %s1918_s30 }
 0x3f4   :  { %1196 = vrot.lane.b32.xlu0 %v2834_v32, %s1919_s3 }
 0x3f6   :  { %1198 = vrot.lane.b32.xlu1 %v2838_v18, %s1919_s3 }
 0x3f8   :  { %1204 = vrot.lane.b32.xlu0 %v2842_v44, %s1919_s3 }
 0x3fa   :  { %1206 = vrot.lane.b32.xlu1 %v2846_v55, %s1919_s3 }
 0x3fc   :  { %1236 = vrot.lane.b32.xlu0 %v2834_v32, %s1920_s14 }
 0x3fe   :  { %1238 = vrot.lane.b32.xlu1 %v2838_v18, %s1920_s14 }
 0x400   :  { %1244 = vrot.lane.b32.xlu0 %v2842_v44, %s1920_s14 }
 0x402   :  { %1246 = vrot.lane.b32.xlu1 %v2846_v55, %s1920_s14 }
 0x404   :  { %1272 = vrot.lane.b32.xlu0 %v2834_v32, %s1921_s15 }
 0x406   :  { %1274 = vrot.lane.b32.xlu1 %v2838_v18, %s1921_s15 }
 0x408   :  { %1280 = vrot.lane.b32.xlu0 %v2842_v44, %s1921_s15 }
 0x40a   :  { %1282 = vrot.lane.b32.xlu1 %v2846_v55, %s1921_s15 }
 0x40c   :  { %1308 = vrot.lane.b32.xlu0 %v2834_v32, %s1922_s16 }
 0x40e   :  { %1310 = vrot.lane.b32.xlu1 %v2838_v18, %s1922_s16  ;;  %v2894_v54 = vpop.permute.xlu0 %1084 }
 0x410   :  { %v2896_v45 = vpop.permute.xlu1 %1086  ;;  %1316 = vrot.lane.b32.xlu0 %v2842_v44, %s1922_s16 }
 0x412   :  { %1318 = vrot.lane.b32.xlu1 %v2846_v55, %s1922_s16  ;;  %v1093_v14 = vpop.permute.xlu0 %1092 }
 0x414   :  { %v1095_v11 = vpop.permute.xlu1 %1094  ;;  %1344 = vrot.lane.b32.xlu0 %v2834_v32, %s1923_s17 }
 0x416   :  { %1346 = vrot.lane.b32.xlu1 %v2838_v18, %s1923_s17  ;;  %v2911_v37 = vpop.permute.xlu0 %1120 }
 0x418   :  { %v2913_v31 = vpop.permute.xlu1 %1122  ;;  %1352 = vrot.lane.b32.xlu0 %v2842_v44, %s1923_s17 }
 0x41a   :  { %1354 = vrot.lane.b32.xlu1 %v2846_v55, %s1923_s17  ;;  %v2922_v63 = vpop.permute.xlu0 %1128 }
 0x41c   :  { %v2924_v36 = vpop.permute.xlu1 %1130  ;;  %1580 = vperm.xlu0 %1903, %v1574_v47  }
 0x41e   :  { %v2929_v4 = vpop.permute.xlu0 %1156 }
 0x420   :  { %v2931_v46 = vpop.permute.xlu1 %1158  ;;  %1590 = vperm.xlu0 %1903, %v1576_v28   ;;  %v1575_v28 = vld [vmem:[%s3418_s11 + $0x8] sm:$0xff] }
 0x421   :  { %1585 = vperm.xlu1 %1904, %v1575_v28  }
 0x422   :  { %v2933_v34 = vpop.permute.xlu0 %1164 }
 0x424   :  { %v2935_v51 = vpop.permute.xlu1 %1166 }
 0x425   :  { %1595 = vperm.xlu1 %1904, %v1577_v43  }
 0x426   :  { %v2937_v21 = vpop.permute.xlu0 %1192 }
 0x428   :  { %v2939_v19 = vpop.permute.xlu1 %1194 }
 0x42a   :  { %v2941_v25 = vpop.permute.xlu0 %1200 }
 0x42c   :  { %v2943_v15 = vpop.permute.xlu1 %1202 }
 0x42e   :  { %v2945_v47 = vpop.permute.xlu0 %1232 }
 0x430   :  { %v2947_v27 = vpop.permute.xlu1 %1234 }
 0x432   :  { %v2949_v33 = vpop.permute.xlu0 %1240 }
 0x434   :  { %v2954_v7 = vpop.permute.xlu1 %1242 }
 0x436   :  { %v2959_v6 = vpop.permute.xlu0 %1268 }
 0x438   :  { %v2961_v12 = vpop.permute.xlu1 %1270 }
 0x439   :  { %3488 = vst [vmem:[#allocation21_spill] sm:$0xff] %v2961_v12 }
 0x43a   :  { %v2963_v40 = vpop.permute.xlu0 %1276 }
 0x43c   :  { %v2965_v26 = vpop.permute.xlu1 %1278 }
 0x43d   :  { %3489 = vst [vmem:[#allocation22_spill] sm:$0xff] %v2965_v26 }
 0x43e   :  { %v2967_v39 = vpop.permute.xlu0 %1304 }
 0x43f   :  { %3490 = vst [vmem:[#allocation23_spill] sm:$0xff] %v2967_v39 }
 0x440   :  { %v2969_v62 = vpop.permute.xlu1 %1306 }
 0x441   :  { %3491 = vst [vmem:[#allocation24_spill] sm:$0xff] %v2969_v62 }
 0x442   :  { %v2971_v28 = vpop.permute.xlu0 %1312 }
 0x443   :  { %3492 = vst [vmem:[#allocation25_spill] sm:$0xff] %v2971_v28 }
 0x444   :  { %v2973_v53 = vpop.permute.xlu1 %1314 }
 0x445   :  { %3493 = vst [vmem:[#allocation26_spill] sm:$0xff] %v2973_v53 }
 0x446   :  { %v2975_v5 = vpop.permute.xlu0 %1340 }
 0x447   :  { %3494 = vst [vmem:[#allocation27_spill] sm:$0xff] %v2975_v5  ;;  %v3498_v5 = vld [vmem:[#allocation5_spill] sm:$0xff] }
 0x448   :  { %v2977_v30 = vpop.permute.xlu1 %1342 }
 0x449   :  { %3495 = vst [vmem:[#allocation28_spill] sm:$0xff] %v2977_v30 }
 0x44a   :  { %v2979_v22 = vpop.permute.xlu0 %1348 }
 0x44b   :  { %3496 = vst [vmem:[#allocation29_spill] sm:$0xff] %v2979_v22 }
 0x44c   :  { %v2981_v43 = vpop.permute.xlu1 %1350 }
 0x44d   :  { %3497 = vst [vmem:[#allocation30_spill] sm:$0xff] %v2981_v43 }
 0x44e   :  { %v1089_v60 = vpop.permute.xlu0 %1088 }
 0x44f   :  { %v1102_v48 = vsel %vm538_vm2, %v1089_v60, %v1093_v14  ;;  %v1104_v62 = vsel %vm538_vm2, %v2894_v54, %v1089_v60 }
 0x450   :  { %v1091_v39 = vpop.permute.xlu1 %1090  ;;  %v1109_v22 = vmul.f32 %v1104_v62, %v3498_v5  ;;  %v1110_v43 = vmul.f32 %v1102_v48, %v2368_v1 }
 0x451   :  { %v1103_v53 = vsel %vm538_vm2, %v1091_v39, %v1095_v11  ;;  %v1105_v30 = vsel %vm538_vm2, %v2896_v45, %v1091_v39 }
 0x452   :  { %v1113_v28 = vmul.f32 %v1105_v30, %v3498_v5  ;;  %v1114_v49 = vmul.f32 %v1103_v53, %v2368_v1  ;;  %v1097_v12 = vpop.permute.xlu0 %1096 }
 0x453   :  { %v1100_v60 = vsel %vm538_vm2, %v1093_v14, %v1097_v12  ;;  %v1106_v26 = vsel %vm538_vm2, %v1097_v12, %v2894_v54 }
 0x454   :  { %v1118_v38 = vpack.c.bf16 %v1114_v49, %v1110_v43  ;;  %v1099_v29 = vpop.permute.xlu1 %1098  ;;  %v1117_v35 = vpack.c.bf16 %v1113_v28, %v1109_v22  ;;  %v1108_v1 = vmul.f32 %v1106_v26, %v2353_v57  ;;  %v1111_v30 = vmul.f32 %v1100_v60, %v2361_v61 }
 0x455   :  { %v1101_v62 = vsel %vm538_vm2, %v1095_v11, %v1099_v29  ;;  %v1107_v48 = vsel %vm538_vm2, %v1099_v29, %v2896_v45 }
 0x456   :  { %v1112_v5 = vmul.f32 %v1107_v48, %v2353_v57  ;;  %v1115_v53 = vmul.f32 %v1101_v62, %v2361_v61  ;;  %1416 = vmatprep.subr.bf16.mxu0 %v1117_v35  ;;  %v1125_v12 = vpop.permute.xlu0 %1124 }
 0x457   :  { %v1138_v49 = vsel %vm591_vm3, %v1125_v12, %v2922_v63  ;;  %v1140_v22 = vsel %vm591_vm3, %v2911_v37, %v1125_v12 }
 0x458   :  { %v1116_v39 = vpack.c.bf16 %v1112_v5, %v1108_v1  ;;  %v1127_v29 = vpop.permute.xlu1 %1126  ;;  %v1119_v54 = vpack.c.bf16 %v1115_v53, %v1111_v30  ;;  %v1145_v26 = vmul.f32 %v1140_v22, %v2381_v59  ;;  %v1146_v35 = vmul.f32 %v1138_v49, %v2414_v8 }
 0x459   :  { %v1139_v57 = vsel %vm591_vm3, %v1127_v29, %v2924_v36  ;;  %v1141_v61 = vsel %vm591_vm3, %v2913_v31, %v1127_v29 }
 0x45a   :  { %v1149_v45 = vmul.f32 %v1141_v61, %v2381_v59  ;;  %v1150_v14 = vmul.f32 %v1139_v57, %v2414_v8  ;;  %1417 = vmatpush1.bf16.msra.mxu0 %v1116_v39  ;;  %1469 = vmatprep.subr.bf16.mxu1 %v1119_v54  ;;  %v1133_v11 = vpop.permute.xlu0 %1132 }
 0x45b   :  { %v1136_v28 = vsel %vm591_vm3, %v2922_v63, %v1133_v11  ;;  %v1142_v43 = vsel %vm591_vm3, %v1133_v11, %v2911_v37  ;;  %1470 = vmatpush1.bf16.msra.mxu1 %v1118_v38 }
 0x45c   :  { %v1154_v60 = vpack.c.bf16 %v1150_v14, %v1146_v35  ;;  %v1135_v62 = vpop.permute.xlu1 %1134  ;;  %v1153_v48 = vpack.c.bf16 %v1149_v45, %v1145_v26  ;;  %v1144_v1 = vmul.f32 %v1142_v43, %v2399_v50  ;;  %v1147_v63 = vmul.f32 %v1136_v28, %v2402_v2 }
 0x45d   :  { %v1137_v59 = vsel %vm591_vm3, %v2924_v36, %v1135_v62  ;;  %v1143_v8 = vsel %vm591_vm3, %v1135_v62, %v2913_v31 }
 0x45e   :  { %v1148_v30 = vmul.f32 %v1143_v8, %v2399_v50  ;;  %v1151_v37 = vmul.f32 %v1137_v59, %v2402_v2  ;;  %1418 = vmatprep.subr.bf16.mxu0 %v1153_v48  ;;  %v1161_v38 = vpop.permute.xlu0 %1160 }
 0x45f   :  { %v1174_v5 = vsel %vm644_vm4, %v1161_v38, %v2933_v34  ;;  %v1176_v36 = vsel %vm644_vm4, %v2929_v4, %v1161_v38 }
 0x460   :  { %v1152_v53 = vpack.c.bf16 %v1148_v30, %v1144_v1  ;;  %v1163_v31 = vpop.permute.xlu1 %1162  ;;  %v1155_v12 = vpack.c.bf16 %v1151_v37, %v1147_v63  ;;  %v1181_v49 = vmul.f32 %v1176_v36, %v2427_v58  ;;  %v1182_v22 = vmul.f32 %v1174_v5, %v2460_v13 }
 0x461   :  { %v1175_v50 = vsel %vm644_vm4, %v1163_v31, %v2935_v51  ;;  %v1177_v2 = vsel %vm644_vm4, %v2931_v46, %v1163_v31 }
 0x462   :  { %v1185_v39 = vmul.f32 %v1177_v2, %v2427_v58  ;;  %v1186_v29 = vmul.f32 %v1175_v50, %v2460_v13  ;;  %1419 = vmatpush1.bf16.msra.mxu0 %v1152_v53  ;;  %1471 = vmatprep.subr.bf16.mxu1 %v1155_v12  ;;  %v1169_v54 = vpop.permute.xlu0 %1168 }
 0x463   :  { %v1172_v26 = vsel %vm644_vm4, %v2933_v34, %v1169_v54  ;;  %v1178_v57 = vsel %vm644_vm4, %v1169_v54, %v2929_v4  ;;  %1472 = vmatpush1.bf16.msra.mxu1 %v1154_v60 }
 0x464   :  { %v1190_v61 = vpack.c.bf16 %v1186_v29, %v1182_v22  ;;  %v1171_v35 = vpop.permute.xlu1 %1170  ;;  %v1189_v45 = vpack.c.bf16 %v1185_v39, %v1181_v49  ;;  %v1180_v14 = vmul.f32 %v1178_v57, %v2445_v9  ;;  %v1183_v34 = vmul.f32 %v1172_v26, %v2448_v41 }
 0x465   :  { %v1173_v58 = vsel %vm644_vm4, %v2935_v51, %v1171_v35  ;;  %v1179_v13 = vsel %vm644_vm4, %v1171_v35, %v2931_v46 }
 0x466   :  { %v1184_v11 = vmul.f32 %v1179_v13, %v2445_v9  ;;  %v1187_v4 = vmul.f32 %v1173_v58, %v2448_v41  ;;  %1420 = vmatprep.subr.bf16.mxu0 %v1189_v45  ;;  %v1197_v28 = vpop.permute.xlu0 %1196 }
 0x467   :  { %v1210_v43 = vsel %vm697_vm5, %v1197_v28, %v2941_v25  ;;  %v1212_v51 = vsel %vm697_vm5, %v2937_v21, %v1197_v28 }
 0x468   :  { %v1188_v60 = vpack.c.bf16 %v1184_v11, %v1180_v14  ;;  %v1199_v46 = vpop.permute.xlu1 %1198  ;;  %v1191_v62 = vpack.c.bf16 %v1187_v4, %v1183_v34  ;;  %v1217_v48 = vmul.f32 %v1212_v51, %v2473_v3  ;;  %v1218_v59 = vmul.f32 %v1210_v43, %v2506_v17  ;;  %v3500_v14 = vld [vmem:[#allocation20_spill] sm:$0xff]  ;;  %v3501_v34 = vld [vmem:[#allocation19_spill] sm:$0xff] }
 0x469   :  { %v1211_v9 = vsel %vm697_vm5, %v1199_v46, %v2943_v15  ;;  %v1213_v41 = vsel %vm697_vm5, %v2939_v19, %v1199_v46  ;;  %v3502_v11 = vpack.c.bf16 %v3500_v14, %v3501_v34  ;;  %v3503_v43 = vld [vmem:[#allocation8_spill] sm:$0xff]  ;;  %v3517_v34 = vld [vmem:[#allocation29_spill] sm:$0xff] }
 0x46a   :  { %v1221_v8 = vmul.f32 %v1213_v41, %v2473_v3  ;;  %v1222_v1 = vmul.f32 %v1211_v9, %v2506_v17  ;;  %1421 = vmatpush1.bf16.msra.mxu0 %v1188_v60  ;;  %1473 = vmatprep.subr.bf16.mxu1 %v1191_v62  ;;  %v1205_v63 = vpop.permute.xlu0 %1204  ;;  %v3505_v60 = vld [vmem:[#allocation21_spill] sm:$0xff] }
 0x46b   :  { %v1208_v30 = vsel %vm697_vm5, %v2941_v25, %v1205_v63  ;;  %v1214_v37 = vsel %vm697_vm5, %v1205_v63, %v2937_v21  ;;  %1474 = vmatpush1.bf16.msra.mxu1 %v1190_v61  ;;  %v3506_v62 = vld [vmem:[#allocation9_spill] sm:$0xff] }
 0x46c   :  { %v1226_v38 = vpack.c.bf16 %v1222_v1, %v1218_v59  ;;  %v1207_v5 = vpop.permute.xlu1 %1206  ;;  %v1225_v36 = vpack.c.bf16 %v1221_v8, %v1217_v48  ;;  %v1216_v53 = vmul.f32 %v1214_v37, %v2491_v10  ;;  %v1219_v25 = vmul.f32 %v1208_v30, %v2494_v52 }
 0x46d   :  { %v1209_v3 = vsel %vm697_vm5, %v2943_v15, %v1207_v5  ;;  %v1215_v17 = vsel %vm697_vm5, %v1207_v5, %v2939_v19 }
 0x46e   :  { %v1220_v31 = vmul.f32 %v1215_v17, %v2491_v10  ;;  %v1223_v21 = vmul.f32 %v1209_v3, %v2494_v52  ;;  %1422 = vmatprep.subr.bf16.mxu0 %v1225_v36  ;;  %v1237_v12 = vpop.permute.xlu0 %1236  ;;  %v1229_v10 = vpack.c.bf16 %v2838_v18, %v2834_v32  ;;  %v1231_v52 = vpack.c.bf16 %v2846_v55, %v2842_v44  ;;  %v3507_v36 = vld [vmem:[#allocation10_spill] sm:$0xff]  ;;  %v3508_v17 = vld [vmem:[#allocation11_spill] sm:$0xff] }
 0x46f   :  { %v1250_v49 = vsel %vm754_vm6, %v1237_v12, %v2949_v33  ;;  %v1252_v39 = vsel %vm754_vm6, %v2945_v47, %v1237_v12  ;;  %v3510_v12 = vld [vmem:[#allocation23_spill] sm:$0xff] }
 0x470   :  { %v1224_v50 = vpack.c.bf16 %v1220_v31, %v1216_v53  ;;  %v1239_v15 = vpop.permute.xlu1 %1238  ;;  %v1227_v2 = vpack.c.bf16 %v1223_v21, %v1219_v25  ;;  %v1257_v29 = vmul.f32 %v1250_v49, %v2527_v0  ;;  %v3509_v31 = vld [vmem:[#allocation25_spill] sm:$0xff] }
 0x471   :  { %v1251_v19 = vsel %vm754_vm6, %v1239_v15, %v2954_v7  ;;  %v1253_v22 = vsel %vm754_vm6, %v2947_v27, %v1239_v15 }
 0x472   :  { %v1261_v54 = vmul.f32 %v1251_v19, %v2527_v0  ;;  %1423 = vmatpush1.bf16.msra.mxu0 %v1224_v50  ;;  %1475 = vmatprep.subr.bf16.mxu1 %v1227_v2  ;;  %v1245_v26 = vpop.permute.xlu0 %1244  ;;  %v1260_v18 = vmul.f32 %v1253_v22, %v2542_v56  ;;  %v1256_v0 = vmul.f32 %v1252_v39, %v2542_v56  ;;  %v3511_v19 = vld [vmem:[#allocation26_spill] sm:$0xff]  ;;  %v3513_v39 = vld [vmem:[#allocation12_spill] sm:$0xff] }
 0x473   :  { %v1248_v57 = vsel %vm754_vm6, %v2949_v33, %v1245_v26  ;;  %v1254_v32 = vsel %vm754_vm6, %v1245_v26, %v2945_v47  ;;  %1424 = vmatprep.subr.bf16.mxu0 %v1229_v10  ;;  %1476 = vmatpush1.bf16.msra.mxu1 %v1226_v38  ;;  %v3499_v56 = vpack.c.bf16 %v2750_v23, %v2746_v20  ;;  %v3504_v23 = vld [vmem:[#allocation22_spill] sm:$0xff]  ;;  %v3512_v10 = vld [vmem:[#allocation24_spill] sm:$0xff] }
 0x474   :  { %v1247_v44 = vpop.permute.xlu1 %1246  ;;  %1477 = vmatprep.subr.bf16.mxu1 %v1231_v52  ;;  %v1265_v55 = vpack.c.bf16 %v1261_v54, %v1257_v29  ;;  %v1258_v35 = vmul.f32 %v1248_v57, %v2548_v24  ;;  %v1259_v47 = vmul.f32 %v1254_v32, %v2551_v16  ;;  %v3514_v54 = vld [vmem:[#allocation13_spill] sm:$0xff] }
 0x475   :  { %v1249_v61 = vsel %vm754_vm6, %v2954_v7, %v1247_v44  ;;  %v1255_v33 = vsel %vm754_vm6, %v1247_v44, %v2947_v27 }
 0x476   :  { %v1262_v45 = vmul.f32 %v1249_v61, %v2548_v24  ;;  %v1263_v58 = vmul.f32 %v1255_v33, %v2551_v16  ;;  %v1273_v13 = vpop.permute.xlu0 %1272  ;;  %1425 = vmatpush1.bf16.msra.mxu0 %v3499_v56  ;;  %v1264_v24 = vpack.c.bf16 %v1260_v18, %v1256_v0 }
 0x477   :  { %v1286_v7 = vsel %vm807_vm7, %v1273_v13, %v2963_v40  ;;  %v1288_v27 = vsel %vm807_vm7, %v2959_v6, %v1273_v13  ;;  %1426 = vmatprep.subr.bf16.mxu0 %v1265_v55  ;;  %1478 = vmatpush1.bf16.msra.mxu1 %v3502_v11  ;;  %v3516_v13 = vld [vmem:[#allocation15_spill] sm:$0xff] }
 0x478   :  { %v1266_v16 = vpack.c.bf16 %v1262_v45, %v1258_v35  ;;  %v1275_v4 = vpop.permute.xlu1 %1274  ;;  %v1267_v28 = vpack.c.bf16 %v1263_v58, %v1259_v47  ;;  %v1292_v20 = vmul.f32 %v1288_v27, %v3503_v43  ;;  %v1293_v48 = vmul.f32 %v1286_v7, %v3506_v62  ;;  %v3515_v45 = vld [vmem:[#allocation14_spill] sm:$0xff] }
 0x479   :  { %v1287_v51 = vsel %vm807_vm7, %v1275_v4, %v3504_v23  ;;  %v1289_v46 = vsel %vm807_vm7, %v3505_v60, %v1275_v4 }
 0x47a   :  { %v1296_v9 = vmul.f32 %v1289_v46, %v3503_v43  ;;  %v1297_v41 = vmul.f32 %v1287_v51, %v3506_v62  ;;  %1479 = vmatprep.subr.bf16.mxu1 %v1267_v28  ;;  %v1281_v59 = vpop.permute.xlu0 %1280  ;;  %1427 = vmatpush1.bf16.msra.mxu0 %v1264_v24  ;;  %v3518_v24 = vld [vmem:[#allocation27_spill] sm:$0xff]  ;;  %v3520_v51 = vld [vmem:[#allocation28_spill] sm:$0xff] }
 0x47b   :  { %v1284_v8 = vsel %vm807_vm7, %v2963_v40, %v1281_v59  ;;  %v1290_v1 = vsel %vm807_vm7, %v1281_v59, %v2959_v6  ;;  %1480 = vmatpush1.bf16.msra.mxu1 %v1266_v16  ;;  %v3521_v46 = vld [vmem:[#allocation16_spill] sm:$0xff] }
 0x47c   :  { %v1300_v63 = vpack.c.bf16 %v1296_v9, %v1292_v20  ;;  %v1283_v30 = vpop.permute.xlu1 %1282  ;;  %v1301_v37 = vpack.c.bf16 %v1297_v41, %v1293_v48  ;;  %v1294_v3 = vmul.f32 %v1284_v8, %v3507_v36  ;;  %v1295_v40 = vmul.f32 %v1290_v1, %v3508_v17  ;;  %v3519_v20 = vld [vmem:[#allocation30_spill] sm:$0xff]  ;;  %v3522_v48 = vld [vmem:[#allocation17_spill] sm:$0xff] }
 0x47d   :  { %v1285_v38 = vsel %vm807_vm7, %v3504_v23, %v1283_v30  ;;  %v1291_v5 = vsel %vm807_vm7, %v1283_v30, %v3505_v60 }
 0x47e   :  { %v1298_v53 = vmul.f32 %v1285_v38, %v3507_v36  ;;  %v1299_v6 = vmul.f32 %v1291_v5, %v3508_v17  ;;  %v1309_v25 = vpop.permute.xlu0 %1308  ;;  %1428 = vmatprep.subr.bf16.mxu0 %v1301_v37 }
 0x47f   :  { %v1322_v21 = vsel %vm860_vm8, %v1309_v25, %v3509_v31  ;;  %v1324_v49 = vsel %vm860_vm8, %v3510_v12, %v1309_v25  ;;  %1429 = vmatpush1.bf16.msra.mxu0 %v1300_v63 }
 0x480   :  { %v1302_v50 = vpack.c.bf16 %v1298_v53, %v1294_v3  ;;  %v1311_v15 = vpop.permute.xlu1 %1310  ;;  %v1303_v2 = vpack.c.bf16 %v1299_v6, %v1295_v40  ;;  %v1328_v29 = vmul.f32 %v1324_v49, %v3513_v39  ;;  %v1329_v26 = vmul.f32 %v1322_v21, %v3514_v54  ;;  %v3523_v3 = vld [vmem:[#allocation4_spill] sm:$0xff]  ;;  %v3524_v40 = vld [vmem:[#allocation18_spill] sm:$0xff] }
 0x481   :  { %v1323_v22 = vsel %vm860_vm8, %v1311_v15, %v3511_v19  ;;  %v1325_v52 = vsel %vm860_vm8, %v3512_v10, %v1311_v15  ;;  %v3527_v15 = vld [vmem:[#allocation7_spill] sm:$0xff] }
 0x482   :  { %v1332_v57 = vmul.f32 %v1325_v52, %v3513_v39  ;;  %v1333_v32 = vmul.f32 %v1323_v22, %v3514_v54  ;;  %1481 = vmatprep.subr.bf16.mxu1 %v1303_v2  ;;  %v1317_v18 = vpop.permute.xlu0 %1316  ;;  %v1913_v2 = vld [vmem:[%s3417_s8 + $0x10] ss:$8 sps:$4 sm:$0xff]   ;;  %v3529_v22 = vmov 0.0   ;;  %v1571_v52 = vld [vmem:[%s3419_s10 + $0x8] sm:$0xff] }
 0x483   :  { %v1320_v44 = vsel %vm860_vm8, %v3509_v31, %v1317_v18  ;;  %v1326_v55 = vsel %vm860_vm8, %v1317_v18, %v3510_v12  ;;  %1482 = vmatpush1.bf16.msra.mxu1 %v1302_v50  ;;  %v1910_v31 = vld [vmem:[%s3417_s8] ss:$8 sps:$4 sm:$0xff]   ;;  %v1572_v39 = vld [vmem:[%s3419_s10 + $0x10] sm:$0xff] }
 0x484   :  { %v1336_v0 = vpack.c.bf16 %v1332_v57, %v1328_v29  ;;  %v1319_v61 = vpop.permute.xlu1 %1318  ;;  %v1337_v33 = vpack.c.bf16 %v1333_v32, %v1329_v26  ;;  %v1330_v58 = vmul.f32 %v1320_v44, %v3515_v45  ;;  %v1331_v56 = vmul.f32 %v1326_v55, %v3516_v13  ;;  %v3525_v12 = vld [vmem:[#allocation6_spill] sm:$0xff]  ;;  %v1573_v29 = vld [vmem:[%s3419_s10 + $0x18] sm:$0xff]  ;;  %v1377_v55 = vld [vmem:[%s3420_s9 + $0x8] sm:$0xff] }
 0x485   :  { %v1321_v35 = vsel %vm860_vm8, %v3511_v19, %v1319_v61  ;;  %v1327_v47 = vsel %vm860_vm8, %v1319_v61, %v3512_v10  ;;  %v3526_v50 = vld [vmem:[#allocation2_spill] sm:$0xff]  ;;  %v3528_v19 = vld [vmem:[#allocation3_spill] sm:$0xff] }
 0x486   :  { %v1334_v7 = vmul.f32 %v1321_v35, %v3515_v45  ;;  %v1335_v27 = vmul.f32 %v1327_v47, %v3516_v13  ;;  %v1345_v14 = vpop.permute.xlu0 %1344  ;;  %1430 = vmatprep.subr.bf16.mxu0 %v1337_v33  ;;  %v1570_v10 = vld [vmem:[%s3419_s10] sm:$0xff]  ;;  %v1381_v35 = vld [vmem:[%s3420_s9 + $0x28] sm:$0xff]  ;;  %v1378_v45 = vld [vmem:[%s3420_s9 + $0x10] sm:$0xff] }
 0x487   :  { %v1358_v11 = vsel %vm913_vm9, %v1345_v14, %v3517_v34  ;;  %v1360_v16 = vsel %vm913_vm9, %v3518_v24, %v1345_v14  ;;  %1431 = vmatpush1.bf16.msra.mxu0 %v1336_v0  ;;  %v1376_v32 = vld [vmem:[%s3420_s9] sm:$0xff]  ;;  %v1382_v14 = vld [vmem:[%s3420_s9 + $0x30] sm:$0xff] }
 0x488   :  { %v1338_v4 = vpack.c.bf16 %v1334_v7, %v1330_v58  ;;  %v1347_v28 = vpop.permute.xlu1 %1346  ;;  %v1339_v43 = vpack.c.bf16 %v1335_v27, %v1331_v56  ;;  %v1364_v62 = vmul.f32 %v3521_v46, %v1360_v16  ;;  %v1365_v9 = vmul.f32 %v3522_v48, %v1358_v11  ;;  %v1380_v0 = vld [vmem:[%s3420_s9 + $0x20] sm:$0xff]  ;;  %v1379_v58 = vld [vmem:[%s3420_s9 + $0x18] sm:$0xff] }
 0x489   :  { %v1359_v23 = vsel %vm913_vm9, %v1347_v28, %v3519_v20  ;;  %v1361_v60 = vsel %vm913_vm9, %v3520_v51, %v1347_v28 }
 0x48a   :  { %v1368_v41 = vmul.f32 %v3521_v46, %v1361_v60  ;;  %v1369_v59 = vmul.f32 %v3522_v48, %v1359_v23  ;;  %1483 = vmatprep.subr.bf16.mxu1 %v1339_v43  ;;  %v1353_v8 = vpop.permute.xlu0 %1352  ;;  %v1383_v43 = vld [vmem:[%s3420_s9 + $0x38] sm:$0xff] }
 0x48b   :  { %v1356_v1 = vsel %vm913_vm9, %v3517_v34, %v1353_v8  ;;  %v1362_v63 = vsel %vm913_vm9, %v1353_v8, %v3518_v24  ;;  %1484 = vmatpush1.bf16.msra.mxu1 %v1338_v4 }
 0x48c   :  { %v1372_v30 = vpack.c.bf16 %v1368_v41, %v1364_v62  ;;  %v1355_v37 = vpop.permute.xlu1 %1354  ;;  %v1373_v38 = vpack.c.bf16 %v1369_v59, %v1365_v9  ;;  %v1366_v17 = vmul.f32 %v3523_v3, %v1356_v1  ;;  %v1367_v53 = vmul.f32 %v3524_v40, %v1362_v63  ;;  %v1385_v62 = vld [vmem:[%s3420_s9 + $0x48] sm:$0xff]  ;;  %v1388_v41 = vld [vmem:[%s3420_s9 + $0x60] sm:$0xff] }
 0x48d   :  { %v1357_v5 = vsel %vm913_vm9, %v3519_v20, %v1355_v37  ;;  %v1363_v36 = vsel %vm913_vm9, %v1355_v37, %v3520_v51  ;;  %v1384_v20 = vld [vmem:[%s3420_s9 + $0x40] sm:$0xff] }
 0x48e   :  { %v1370_v6 = vmul.f32 %v3523_v3, %v1357_v5  ;;  %v1371_v25 = vmul.f32 %v3524_v40, %v1363_v36  ;;  %1432 = vmatprep.subr.bf16.mxu0 %v1373_v38 }
 0x48f   :  { %1433 = vmatpush1.bf16.msra.mxu0 %v1372_v30 }
 0x490   :  { %v1374_v21 = vpack.c.bf16 %v1370_v6, %v1366_v17  ;;  %1886 = vmatprep.subr.bf16.mxu0 %v3525_v12  ;;  %v1375_v49 = vpack.c.bf16 %v1371_v25, %v1367_v53 }
 0x492   :  { %1449 = vmatmul.mubr.bf16.vlgmr.msra.gmra.mrb[16].mxu0 %v1910_v31  ;;  %1485 = vmatprep.subr.bf16.mxu1 %v1375_v49 }
 0x493   :  { %1486 = vmatpush1.bf16.msra.mxu1 %v1374_v21  ;;  %1888 = vmatpush1.bf16.msra.mxu0 %v3526_v50 }
 0x494   :  { %1890 = vmatprep.subr.bf16.mxu1 %v3527_v15  ;;  %1850 = vmatprep.mubr.msk.bf16.mxu0 %vm65_vm0, %v1911_v42 }
 0x496   :  { %1502 = vmatmul.mubr.bf16.vlgmr.msra.gmra.mrb[16].mxu1 %v1910_v31  ;;  %v1389_v31 = vld [vmem:[%s3420_s9 + $0x68] sm:$0xff] }
 0x497   :  { %1892 = vmatpush1.bf16.msra.mxu1 %v3528_v19  ;;  %1852 = vmatprep.mubr.msk.bf16.mxu1 %vm65_vm0, %v1911_v42 }
 0x49a   :  { %1459 = vmatmul.mubr.bf16.gmra.mrb[20].mxu0 %v1913_v2 }
 0x49b   :  { %1674 = vmatprep.mubr.f32.mxu0 %v3529_v22  ;;  %v1581_v3 = vpop.permute.xlu0 %1580 }
 0x49e   :  { %1512 = vmatmul.mubr.bf16.gmra.mrb[20].mxu1 %v1913_v2 }
 0x49f   :  { %1763 = vmatprep.mubr.f32.mxu1 %v3529_v22 }
 0x4a0   :  { %v1586_v15 = vpop.permute.xlu1 %1585 }
 0x4a2   :  { %1853 = vmatmul.mubr.msk.f32.vlgmr.msra.gmra.mrb[24].mxu0 %vm65_vm0, %v1570_v10 }
 0x4a3   :  { %1680 = vmatprep.mubr.f32.mxu0 %v3529_v22 }
 0x4a6   :  { %1854 = vmatmul.mubr.msk.f32.gmra.mrb[26].mxu0 %vm65_vm0, %v1571_v52  ;;  %1857 = vmatmul.mubr.msk.f32.vlgmr.msra.gmra.mrb[24].mxu1 %vm65_vm0, %v1570_v10  ;;  %v1386_v10 = vld [vmem:[%s3420_s9 + $0x50] sm:$0xff] }
 0x4a7   :  { %1686 = vmatprep.mubr.f32.mxu0 %v3529_v22  ;;  %1769 = vmatprep.mubr.f32.mxu1 %v3529_v22 }
 0x4aa   :  { %1855 = vmatmul.mubr.msk.f32.gmra.mrb[28].mxu0 %vm65_vm0, %v1572_v39  ;;  %1858 = vmatmul.mubr.msk.f32.gmra.mrb[26].mxu1 %vm65_vm0, %v1571_v52 }
 0x4ab   :  { %1692 = vmatprep.mubr.f32.mxu0 %v3529_v22  ;;  %1775 = vmatprep.mubr.f32.mxu1 %v3529_v22 }
 0x4ae   :  { %1856 = vmatmul.mubr.msk.f32.gmra.mrb[30].mxu0 %vm65_vm0, %v1573_v29  ;;  %1859 = vmatmul.mubr.msk.f32.gmra.mrb[28].mxu1 %vm65_vm0, %v1572_v39 }
 0x4af   :  { %1781 = vmatprep.mubr.f32.mxu1 %v3529_v22 }
 0x4b2   :  { %1860 = vmatmul.mubr.msk.f32.gmra.mrb[30].mxu1 %vm65_vm0, %v1573_v29 }
 0x565   :  { %v1450_v54 = vpop.f32.mrb[16].mxu0 }
 0x566   :  { %v1452_v26 = vpop.f32.mrb[17].mxu0  ;;  %v1451_v33 = vadd.f32 %v1450_v54, %v1376_v32 }
 0x567   :  { %v1454_v57 = vpop.f32.mrb[18].mxu0  ;;  %v1453_v56 = vadd.f32 %v1452_v26, %v1377_v55  ;;  %v1387_v26 = vld [vmem:[%s3420_s9 + $0x58] sm:$0xff] }
 0x568   :  { %v1456_v18 = vpop.f32.mrb[19].mxu0  ;;  %v1455_v7 = vadd.f32 %v1454_v57, %v1380_v0  ;;  %v1538_v24 = vmul.f32 0.2, %v1451_v33  ;;  %vm1522_vm0 = vcmp.ge.f32.partialorder %v1451_v33, 0.0 }
 0x569   :  { %v1503_v44 = vpop.f32.mrb[16].mxu1  ;;  %v1457_v34 = vadd.f32 %v1456_v18, %v1381_v35  ;;  %v1539_v60 = vmul.f32 0.2, %v1453_v56  ;;  %vm1523_vm2 = vcmp.ge.f32.partialorder %v1453_v56, 0.0 }
 0x56a   :  { %v1505_v61 = vpop.f32.mrb[17].mxu1  ;;  %v1504_v16 = vadd.f32 %v1503_v44, %v1378_v45  ;;  %v1542_v46 = vmul.f32 0.2, %v1455_v7  ;;  %vm1526_vm3 = vcmp.ge.f32.partialorder %v1455_v7, 0.0  ;;  %v1554_v30 = vsel %vm1522_vm0, %v1451_v33, %v1538_v24  ;;  %v1390_v45 = vld [vmem:[%s3420_s9 + $0x70] sm:$0xff]  ;;  %v1391_v24 = vld [vmem:[%s3420_s9 + $0x78] sm:$0xff] }
 0x56b   :  { %v1507_v47 = vpop.f32.mrb[18].mxu1  ;;  %v1506_v4 = vadd.f32 %v1505_v61, %v1379_v58  ;;  %v1543_v9 = vmul.f32 0.2, %v1457_v34  ;;  %vm1527_vm4 = vcmp.ge.f32.partialorder %v1457_v34, 0.0  ;;  %v1555_v53 = vsel %vm1523_vm2, %v1453_v56, %v1539_v60  ;;  %v1591_v56 = vpop.permute.xlu0 %1590 }
 0x56c   :  { %v1509_v13 = vpop.f32.mrb[19].mxu1  ;;  %v1508_v23 = vadd.f32 %v1507_v47, %v1382_v14  ;;  %v1540_v1 = vmul.f32 0.2, %v1504_v16  ;;  %vm1524_vm5 = vcmp.ge.f32.partialorder %v1504_v16, 0.0  ;;  %v1558_v6 = vsel %vm1526_vm3, %v1455_v7, %v1542_v46 }
 0x56d   :  { %v1460_v27 = vpop.f32.mrb[20].mxu0  ;;  %v1510_v59 = vadd.f32 %v1509_v13, %v1383_v43  ;;  %v1541_v63 = vmul.f32 0.2, %v1506_v4  ;;  %vm1525_vm6 = vcmp.ge.f32.partialorder %v1506_v4, 0.0  ;;  %v1559_v42 = vsel %vm1527_vm4, %v1457_v34, %v1543_v9 }
 0x56e   :  { %v1462_v11 = vpop.f32.mrb[21].mxu0  ;;  %v1461_v38 = vadd.f32 %v1460_v27, %v1384_v20  ;;  %v1544_v5 = vmul.f32 0.2, %v1508_v23  ;;  %vm1528_vm7 = vcmp.ge.f32.partialorder %v1508_v23, 0.0  ;;  %v1556_v2 = vsel %vm1524_vm5, %v1504_v16, %v1540_v1 }
 0x56f   :  { %v1464_v28 = vpop.f32.mrb[22].mxu0  ;;  %v1463_v17 = vadd.f32 %v1462_v11, %v1385_v62  ;;  %v1545_v21 = vmul.f32 0.2, %v1510_v59  ;;  %vm1529_vm8 = vcmp.ge.f32.partialorder %v1510_v59, 0.0  ;;  %v1557_v19 = vsel %vm1525_vm6, %v1506_v4, %v1541_v63 }
 0x570   :  { %v1466_v51 = vpop.f32.mrb[23].mxu0  ;;  %v3326_v25 = vadd.f32 %v1464_v28, %v1388_v41  ;;  %vm1530_vm9 = vcmp.ge.f32.partialorder %v1461_v38, 0.0  ;;  %v1546_v22 = vmul.f32 0.2, %v1461_v38  ;;  %v1560_v39 = vsel %vm1528_vm7, %v1508_v23, %v1544_v5 }
 0x571   :  { %v1513_v48 = vpop.f32.mrb[20].mxu1  ;;  %vm1531_vm11 = vcmp.ge.f32.partialorder %v1463_v17, 0.0  ;;  %v1547_v29 = vmul.f32 0.2, %v1463_v17  ;;  %v1467_v54 = vadd.f32 %v1466_v51, %v1389_v31  ;;  %v1561_v33 = vsel %vm1529_vm8, %v1510_v59, %v1545_v21  ;;  %v1596_v59 = vpop.permute.xlu1 %1595 }
 0x572   :  { %v1515_v8 = vpop.f32.mrb[21].mxu1  ;;  %vm1534_vm12 = vcmp.ge.f32.partialorder %v3326_v25, 0.0  ;;  %v1550_v35 = vmul.f32 0.2, %v3326_v25  ;;  %v1514_v47 = vadd.f32 %v1513_v48, %v1386_v10  ;;  %v1562_v34 = vsel %vm1530_vm9, %v1461_v38, %v1546_v22 }
 0x573   :  { %v1517_v37 = vpop.f32.mrb[22].mxu1  ;;  %v1516_v7 = vadd.f32 %v1515_v8, %v1387_v26  ;;  %vm1535_vm13 = vcmp.ge.f32.partialorder %v1467_v54, 0.0  ;;  %v1551_v11 = vmul.f32 0.2, %v1467_v54  ;;  %v1563_v60 = vsel %vm1531_vm11, %v1463_v17, %v1547_v29 }
 0x574   :  { %v3322_v36 = vpop.f32.mrb[23].mxu1  ;;  %v1518_v20 = vadd.f32 %v1517_v37, %v1390_v45  ;;  %vm1532_vm14 = vcmp.ge.f32.partialorder %v1514_v47, 0.0  ;;  %v1548_v48 = vmul.f32 0.2, %v1514_v47  ;;  %v1566_v5 = vsel %vm1534_vm12, %v3326_v25, %v1550_v35 }
 0x575   :  { %v1676_v40 = vpop.f32.mrb[24].mxu0  ;;  %v1549_v8 = vmul.f32 0.2, %v1516_v7  ;;  %v1520_v1 = vadd.f32 %v3322_v36, %v1391_v24  ;;  %vm1533_vm15 = vcmp.ge.f32.partialorder %v1516_v7, 0.0 }
 0x576   :  { %v1677_v12 = vadd.f32 %v1676_v40, %v1581_v3  ;;  %v1678_v49 = vpop.f32.mrb[25].mxu0  ;;  %vm1536_vm1 = vcmp.ge.f32.partialorder %v1518_v20, 0.0  ;;  %v1552_v21 = vmul.f32 0.2, %v1518_v20  ;;  %v1564_v25 = vsel %vm1532_vm14, %v1514_v47, %v1548_v48 }
 0x577   :  { %v1679_v50 = vadd.f32 %v1678_v49, %v1581_v3  ;;  %vm1537_vm10 = vcmp.ge.f32.partialorder %v1520_v1, 0.0 }
 0x578   :  { %v1788_v52 = vadd.f32 %v1677_v12, %v1554_v30  ;;  %v1568_v29 = vsel %vm1536_vm1, %v1518_v20, %v1552_v21 }
 0x579   :  { %v1789_v57 = vadd.f32 %v1679_v50, %v1555_v53  ;;  %v1682_v32 = vpop.f32.mrb[26].mxu0  ;;  %v1765_v18 = vpop.f32.mrb[24].mxu1  ;;  %v1567_v53 = vsel %vm1535_vm13, %v1467_v54, %v1551_v11 }
 0x57a   :  { %1804 = vst [vmem:[%s3421_s13] sm:$0xff] %v1788_v52  ;;  %v1683_v44 = vadd.f32 %v1682_v32, %v1586_v15  ;;  %v1766_v55 = vadd.f32 %v1765_v18, %v1581_v3  ;;  %v1684_v0 = vpop.f32.mrb[27].mxu0  ;;  %v1767_v61 = vpop.f32.mrb[25].mxu1 }
 0x57b   :  { %1805 = vst [vmem:[%s3421_s13 + $0x8] sm:$0xff] %v1789_v57  ;;  %v1685_v58 = vadd.f32 %v1684_v0, %v1586_v15  ;;  %v1768_v13 = vadd.f32 %v1767_v61, %v1581_v3 }
 0x57c   :  { %v1792_v27 = vadd.f32 %v1683_v44, %v1558_v6  ;;  %v1790_v14 = vadd.f32 %v1766_v55, %v1556_v2  ;;  %v1565_v2 = vsel %vm1533_vm15, %v1516_v7, %v1549_v8 }
 0x57d   :  { %v1793_v16 = vadd.f32 %v1685_v58, %v1559_v42  ;;  %v1791_v4 = vadd.f32 %v1768_v13, %v1557_v19  ;;  %v1688_v28 = vpop.f32.mrb[28].mxu0  ;;  %v1771_v43 = vpop.f32.mrb[26].mxu1  ;;  %v1553_v42 = vmul.f32 0.2, %v1520_v1 }
 0x57e   :  { %1806 = vst [vmem:[%s3421_s13 + $0x10] sm:$0xff] %v1792_v27  ;;  %1861 = vst [vmem:[%s3421_s13 + $0x40] sm:$0xff] %v1790_v14  ;;  %v1689_v23 = vadd.f32 %v1688_v28, %v1591_v56  ;;  %v1772_v51 = vadd.f32 %v1771_v43, %v1586_v15  ;;  %v1690_v46 = vpop.f32.mrb[29].mxu0  ;;  %v1773_v62 = vpop.f32.mrb[27].mxu1 }
 0x57f   :  { %1807 = vst [vmem:[%s3421_s13 + $0x18] sm:$0xff] %v1793_v16  ;;  %1862 = vst [vmem:[%s3421_s13 + $0x48] sm:$0xff] %v1791_v4  ;;  %v1691_v9 = vadd.f32 %v1690_v46, %v1591_v56  ;;  %v1774_v41 = vadd.f32 %v1773_v62, %v1586_v15  ;;  %v1569_v57 = vsel %vm1537_vm10, %v1520_v1, %v1553_v42 }
 0x580   :  { %v1796_v63 = vadd.f32 %v1689_v23, %v1562_v34  ;;  %v1794_v30 = vadd.f32 %v1772_v51, %v1560_v39 }
 0x581   :  { %v1797_v37 = vadd.f32 %v1691_v9, %v1563_v60  ;;  %v1795_v38 = vadd.f32 %v1774_v41, %v1561_v33  ;;  %v1694_v3 = vpop.f32.mrb[30].mxu0  ;;  %v1777_v17 = vpop.f32.mrb[28].mxu1 }
 0x582   :  { %1808 = vst [vmem:[%s3421_s13 + $0x20] sm:$0xff] %v1796_v63  ;;  %1863 = vst [vmem:[%s3421_s13 + $0x50] sm:$0xff] %v1794_v30  ;;  %v1695_v36 = vadd.f32 %v1694_v3, %v1596_v59  ;;  %v1778_v40 = vadd.f32 %v1777_v17, %v1591_v56  ;;  %v1696_v6 = vpop.f32.mrb[31].mxu0  ;;  %v1779_v31 = vpop.f32.mrb[29].mxu1 }
 0x583   :  { %1809 = vst [vmem:[%s3421_s13 + $0x28] sm:$0xff] %v1797_v37  ;;  %1864 = vst [vmem:[%s3421_s13 + $0x58] sm:$0xff] %v1795_v38  ;;  %v1697_v12 = vadd.f32 %v1696_v6, %v1596_v59  ;;  %v1780_v49 = vadd.f32 %v1779_v31, %v1591_v56 }
 0x584   :  { %v1800_v50 = vadd.f32 %v1695_v36, %v1566_v5  ;;  %v1798_v15 = vadd.f32 %v1778_v40, %v1564_v25 }
 0x585   :  { %v1801_v19 = vadd.f32 %v1697_v12, %v1567_v53  ;;  %v1799_v22 = vadd.f32 %v1780_v49, %v1565_v2  ;;  %v1783_v10 = vpop.f32.mrb[30].mxu1 }
 0x586   :  { %1810 = vst [vmem:[%s3421_s13 + $0x30] sm:$0xff] %v1800_v50  ;;  %1865 = vst [vmem:[%s3421_s13 + $0x60] sm:$0xff] %v1798_v15  ;;  %v1784_v52 = vadd.f32 %v1783_v10, %v1596_v59  ;;  %v1785_v39 = vpop.f32.mrb[31].mxu1 }
 0x587   :  { %1811 = vst [vmem:[%s3421_s13 + $0x38] sm:$0xff] %v1801_v19  ;;  %1866 = vst [vmem:[%s3421_s13 + $0x68] sm:$0xff] %v1799_v22  ;;  %v1786_v54 = vadd.f32 %v1785_v39, %v1596_v59 }
 0x588   :  { %v1802_v26 = vadd.f32 %v1784_v52, %v1568_v29 }
 0x589   :  { %v1803_v32 = vadd.f32 %v1786_v54, %v1569_v57 }
 0x58a   :  { %1867 = vst [vmem:[%s3421_s13 + $0x70] sm:$0xff] %v1802_v26 }
 0x58b   :  { %1868 = vst [vmem:[%s3421_s13 + $0x78] sm:$0xff] %v1803_v32 }

</bundles_post_ra>
